<compile_context>
chip_gen: v6e
topology: v6e:2x2x1
jax: 0.10.0
libtpu: 0.0.40
codegen_flags: <defaults>
</compile_context>

<pallas_src>
import jax
import jax.numpy as jnp
from jax.experimental import pallas as pl
from jax.experimental.pallas import tpu as pltpu

INPUT_SIZE = 1000
HIDDEN_1 = 500
HIDDEN_2 = 100
NUM_CLASSES = 4

# Lane-aligned padded widths for hidden/output feature dims (zero padding,
# ReLU(0)=0 -> mathematically inert).  Input K dim stays at 1000.
PAD_H1 = 512
PAD_H2 = 128
PAD_OUT = 128

TM_MAX = 512  # max batch-tile rows per grid step


def _round_up(v, m):
    return ((v + m - 1) // m) * m


def _batch_tiling(b_pad):
    """Pick (tile_rows, grid_steps) for a batch already rounded to a multiple of 8."""
    if b_pad <= 16:
        return b_pad, 1  # single tiny block
    # >= 2 grid steps so both v7x TensorCores get work; 16-row aligned for the
    # bf16 LHS; capped at TM_MAX.
    tm = min(TM_MAX, _round_up(-(-b_pad // 2), 16))
    return tm, -(-b_pad // tm)


def mlp_kernel(x_ref, w1_ref, b1_ref, w2_ref, b2_ref, w3_ref, b3_ref, o_ref):
    # x tile arrives as raw f32 from HBM; cast to bf16 in VMEM (no HBM repack).
    x = x_ref[...].astype(jnp.bfloat16)                         # (tm, 1000)
    h1 = jnp.dot(x, w1_ref[...], preferred_element_type=jnp.float32) + b1_ref[...]
    h1 = jnp.maximum(h1, 0.0)                                   # f32 elementwise (v5e-safe)
    h2 = jnp.dot(h1.astype(jnp.bfloat16), w2_ref[...],
                 preferred_element_type=jnp.float32) + b2_ref[...]
    h2 = jnp.maximum(h2, 0.0)
    out = jnp.dot(h2.astype(jnp.bfloat16), w3_ref[...],
                  preferred_element_type=jnp.float32) + b3_ref[...]
    o_ref[...] = out.astype(o_ref.dtype)                        # lane-dense (tm, 128) bf16 store


def neural_net_forward(x, packed):
    """x: (B, INPUT_SIZE) float32. packed: lane-padded bf16 weights / f32 biases."""
    b = x.shape[0]
    x = x.astype(jnp.float32)

    # Only the batch dim is ever padded wrapper-side (to a multiple of 8), and only
    # when B itself is ragged; the feature dim is never repacked.
    b_pad = _round_up(b, 8)
    if b_pad != b:
        x = jnp.pad(x, ((0, b_pad - b), (0, 0)))

    tm, grid_b = _batch_tiling(b_pad)

    w1, b1 = packed["w1"], packed["b1"]
    w2, b2 = packed["w2"], packed["b2"]
    w3, b3 = packed["w3"], packed["b3"]

    # Constant index_map -> weights/biases fetched once, VMEM-resident across the grid.
    resident = lambda a: pl.BlockSpec(a.shape, lambda i: (0, 0))

    out_padded = pl.pallas_call(
        mlp_kernel,
        out_shape=jax.ShapeDtypeStruct((b_pad, PAD_OUT), jnp.bfloat16),
        grid=(grid_b,),
        in_specs=[
            pl.BlockSpec((tm, INPUT_SIZE), lambda i: (i, 0)),   # x: pipelined over batch
            resident(w1), resident(b1),
            resident(w2), resident(b2),
            resident(w3), resident(b3),
        ],
        out_specs=pl.BlockSpec((tm, PAD_OUT), lambda i: (i, 0)),
        compiler_params=pltpu.CompilerParams(
            dimension_semantics=("parallel",),   # megacore split over batch tiles (v7x)
            vmem_limit_bytes=32 << 20,
        ),
    )(x, w1, b1, w2, b2, w3, b3)

    return out_padded[:b, :NUM_CLASSES].astype(jnp.float32)


def init_params(key):
    """Deterministic init mimicking nn.Linear's U(-1/sqrt(fan_in), 1/sqrt(fan_in)).
    Weights stored as (in_features, out_features) — i.e. W^T of the PyTorch layout."""
    def linear(key, fan_in, fan_out):
        kw, kb = jax.random.split(key)
        bound = 1.0 / jnp.sqrt(fan_in)
        w = jax.random.uniform(kw, (fan_in, fan_out), jnp.float32, -bound, bound)
        bias = jax.random.uniform(kb, (1, fan_out), jnp.float32, -bound, bound)
        return w, bias

    k1, k2, k3 = jax.random.split(key, 3)
    w1, b1 = linear(k1, INPUT_SIZE, HIDDEN_1)
    w2, b2 = linear(k2, HIDDEN_1, HIDDEN_2)
    w3, b3 = linear(k3, HIDDEN_2, NUM_CLASSES)
    return {"w1": w1, "b1": b1, "w2": w2, "b2": b2, "w3": w3, "b3": b3}


def pack_params(params):
    """One-time: zero-pad hidden/output dims to lane-aligned widths; weights -> bf16,
    biases stay f32.  The input (K=1000) dim of w1 is NOT padded."""
    def pad_w(w, pin, pout):
        wp = jnp.zeros((pin, pout), jnp.float32).at[: w.shape[0], : w.shape[1]].set(w)
        return wp.astype(jnp.bfloat16)

    def pad_b(bv, pout):
        return jnp.zeros((1, pout), jnp.float32).at[:, : bv.shape[1]].set(bv)

    return {
        "w1": pad_w(params["w1"], INPUT_SIZE, PAD_H1), "b1": pad_b(params["b1"], PAD_H1),
        "w2": pad_w(params["w2"], PAD_H1, PAD_H2),     "b2": pad_b(params["b2"], PAD_H2),
        "w3": pad_w(params["w3"], PAD_H2, PAD_OUT),    "b3": pad_b(params["b3"], PAD_OUT),
    }


def reference_forward(x, params):
    h1 = jnp.maximum(x @ params["w1"] + params["b1"], 0.0)
    h2 = jnp.maximum(h1 @ params["w2"] + params["b2"], 0.0)
    return h2 @ params["w3"] + params["b3"]


if __name__ == "__main__":
    key = jax.random.PRNGKey(0)
    kp, kx1, kx2 = jax.random.split(key, 3)
    params = init_params(kp)
    packed = pack_params(params)

    # Small batch: single grid step.
    x_small = jax.random.normal(kx1, (8, INPUT_SIZE), jnp.float32)
    out_small = jax.block_until_ready(neural_net_forward(x_small, packed))
    ref_small = reference_forward(x_small, params)
    assert out_small.shape == (8, NUM_CLASSES)
    assert jnp.allclose(out_small, ref_small, atol=5e-2, rtol=5e-2), \
        float(jnp.max(jnp.abs(out_small - ref_small)))

    # Larger batch: two batch tiles (exercises pipelining / v7x megacore split).
    x_big = jax.random.normal(kx2, (64, INPUT_SIZE), jnp.float32)
    out_big = jax.block_until_ready(neural_net_forward(x_big, packed))
    ref_big = reference_forward(x_big, params)
    assert out_big.shape == (64, NUM_CLASSES)
    assert jnp.allclose(out_big, ref_big, atol=5e-2, rtol=5e-2), \
        float(jnp.max(jnp.abs(out_big - ref_big)))

    print("KERNEL_OK")
</pallas_src>

<mosaic_0001>
module attributes {stable_mosaic.version = 11 : i64} {
  func.func @mlp_kernel(%arg0: i32, %arg1: memref<8x1000xf32, #tpu.memory_space<vmem>>, %arg2: memref<1000x512xbf16, #tpu.memory_space<vmem>>, %arg3: memref<1x512xf32, #tpu.memory_space<vmem>>, %arg4: memref<512x128xbf16, #tpu.memory_space<vmem>>, %arg5: memref<1x128xf32, #tpu.memory_space<vmem>>, %arg6: memref<128x128xbf16, #tpu.memory_space<vmem>>, %arg7: memref<1x128xf32, #tpu.memory_space<vmem>>, %arg8: memref<8x128xbf16, #tpu.memory_space<vmem>>) attributes {dimension_semantics = [#tpu.dimension_semantics<parallel>], iteration_bounds = array<i64: 1>, scalar_prefetch = 0 : i64, scratch_operands = 0 : i64, tpu.core_type = #tpu.core_type<tc>, window_params = [{transform_indices = @transform_0, window_bounds = array<i64: 8, 1000>}, {pipeline_mode = #tpu.pipeline_mode<synchronous>, transform_indices = @transform_1, window_bounds = array<i64: 1000, 512>}, {pipeline_mode = #tpu.pipeline_mode<synchronous>, transform_indices = @transform_2, window_bounds = array<i64: 1, 512>}, {pipeline_mode = #tpu.pipeline_mode<synchronous>, transform_indices = @transform_3, window_bounds = array<i64: 512, 128>}, {pipeline_mode = #tpu.pipeline_mode<synchronous>, transform_indices = @transform_4, window_bounds = array<i64: 1, 128>}, {pipeline_mode = #tpu.pipeline_mode<synchronous>, transform_indices = @transform_5, window_bounds = array<i64: 128, 128>}, {pipeline_mode = #tpu.pipeline_mode<synchronous>, transform_indices = @transform_6, window_bounds = array<i64: 1, 128>}, {transform_indices = @transform_7, window_bounds = array<i64: 8, 128>}]} {
    %c0 = arith.constant 0 : index
    %c0_0 = arith.constant 0 : index
    %0 = vector.load %arg1[%c0, %c0_0] : memref<8x1000xf32, #tpu.memory_space<vmem>>, vector<8x1000xf32>
    %1 = arith.truncf %0 : vector<8x1000xf32> to vector<8x1000xbf16>
    %c0_1 = arith.constant 0 : index
    %c0_2 = arith.constant 0 : index
    %2 = vector.load %arg2[%c0_1, %c0_2] : memref<1000x512xbf16, #tpu.memory_space<vmem>>, vector<1000x512xbf16>
    %cst = arith.constant dense<0.000000e+00> : vector<8x512xf32>
    %3 = tpu.matmul %1, %2, %cst {dimension_numbers = #tpu.dot_dimension_numbers<[1], [0], [0], [1], [0, 0, 1, 1], [], []>} : vector<8x1000xbf16>, vector<1000x512xbf16>, vector<8x512xf32> -> vector<8x512xf32>
    %c0_3 = arith.constant 0 : index
    %c0_4 = arith.constant 0 : index
    %4 = vector.load %arg3[%c0_3, %c0_4] : memref<1x512xf32, #tpu.memory_space<vmem>>, vector<1x512xf32>
    %5 = vector.broadcast %4 : vector<1x512xf32> to vector<8x512xf32>
    %6 = arith.addf %3, %5 : vector<8x512xf32>
    %cst_5 = arith.constant 0.000000e+00 : f32
    %7 = vector.broadcast %cst_5 : f32 to vector<8x512xf32>
    %8 = arith.maximumf %6, %7 : vector<8x512xf32>
    %9 = arith.truncf %8 : vector<8x512xf32> to vector<8x512xbf16>
    %c0_6 = arith.constant 0 : index
    %c0_7 = arith.constant 0 : index
    %10 = vector.load %arg4[%c0_6, %c0_7] : memref<512x128xbf16, #tpu.memory_space<vmem>>, vector<512x128xbf16>
    %cst_8 = arith.constant dense<0.000000e+00> : vector<8x128xf32>
    %11 = tpu.matmul %9, %10, %cst_8 {dimension_numbers = #tpu.dot_dimension_numbers<[1], [0], [0], [1], [0, 0, 1, 1], [], []>} : vector<8x512xbf16>, vector<512x128xbf16>, vector<8x128xf32> -> vector<8x128xf32>
    %c0_9 = arith.constant 0 : index
    %c0_10 = arith.constant 0 : index
    %12 = vector.load %arg5[%c0_9, %c0_10] : memref<1x128xf32, #tpu.memory_space<vmem>>, vector<1x128xf32>
    %13 = vector.broadcast %12 : vector<1x128xf32> to vector<8x128xf32>
    %14 = arith.addf %11, %13 : vector<8x128xf32>
    %cst_11 = arith.constant 0.000000e+00 : f32
    %15 = vector.broadcast %cst_11 : f32 to vector<8x128xf32>
    %16 = arith.maximumf %14, %15 : vector<8x128xf32>
    %17 = arith.truncf %16 : vector<8x128xf32> to vector<8x128xbf16>
    %c0_12 = arith.constant 0 : index
    %c0_13 = arith.constant 0 : index
    %18 = vector.load %arg6[%c0_12, %c0_13] : memref<128x128xbf16, #tpu.memory_space<vmem>>, vector<128x128xbf16>
    %cst_14 = arith.constant dense<0.000000e+00> : vector<8x128xf32>
    %19 = tpu.matmul %17, %18, %cst_14 {dimension_numbers = #tpu.dot_dimension_numbers<[1], [0], [0], [1], [0, 0, 1, 1], [], []>} : vector<8x128xbf16>, vector<128x128xbf16>, vector<8x128xf32> -> vector<8x128xf32>
    %c0_15 = arith.constant 0 : index
    %c0_16 = arith.constant 0 : index
    %20 = vector.load %arg7[%c0_15, %c0_16] : memref<1x128xf32, #tpu.memory_space<vmem>>, vector<1x128xf32>
    %21 = vector.broadcast %20 : vector<1x128xf32> to vector<8x128xf32>
    %22 = arith.addf %19, %21 : vector<8x128xf32>
    %23 = arith.truncf %22 : vector<8x128xf32> to vector<8x128xbf16>
    %c0_17 = arith.constant 0 : index
    %c0_18 = arith.constant 0 : index
    %24 = vector.load %arg8[%c0_17, %c0_18] : memref<8x128xbf16, #tpu.memory_space<vmem>>, vector<8x128xbf16>
    tpu.vector_store %arg8[%c0_17, %c0_18], %23 {strides = array<i32>} : memref<8x128xbf16, #tpu.memory_space<vmem>>, vector<8x128xbf16>,
    return
  }
  func.func @transform_0(%arg0: i32) -> (i32, i32) {
    %c0_i32 = arith.constant 0 : i32
    %c0_i32_0 = arith.constant 0 : i32
    return %arg0, %c0_i32 : i32, i32
  }
  func.func @transform_1(%arg0: i32) -> (i32, i32) {
    %c0_i32 = arith.constant 0 : i32
    %c0_i32_0 = arith.constant 0 : i32
    %c0_i32_1 = arith.constant 0 : i32
    return %c0_i32, %c0_i32_0 : i32, i32
  }
  func.func @transform_2(%arg0: i32) -> (i32, i32) {
    %c0_i32 = arith.constant 0 : i32
    %c0_i32_0 = arith.constant 0 : i32
    %c0_i32_1 = arith.constant 0 : i32
    return %c0_i32, %c0_i32_0 : i32, i32
  }
  func.func @transform_3(%arg0: i32) -> (i32, i32) {
    %c0_i32 = arith.constant 0 : i32
    %c0_i32_0 = arith.constant 0 : i32
    %c0_i32_1 = arith.constant 0 : i32
    return %c0_i32, %c0_i32_0 : i32, i32
  }
  func.func @transform_4(%arg0: i32) -> (i32, i32) {
    %c0_i32 = arith.constant 0 : i32
    %c0_i32_0 = arith.constant 0 : i32
    %c0_i32_1 = arith.constant 0 : i32
    return %c0_i32, %c0_i32_0 : i32, i32
  }
  func.func @transform_5(%arg0: i32) -> (i32, i32) {
    %c0_i32 = arith.constant 0 : i32
    %c0_i32_0 = arith.constant 0 : i32
    %c0_i32_1 = arith.constant 0 : i32
    return %c0_i32, %c0_i32_0 : i32, i32
  }
  func.func @transform_6(%arg0: i32) -> (i32, i32) {
    %c0_i32 = arith.constant 0 : i32
    %c0_i32_0 = arith.constant 0 : i32
    %c0_i32_1 = arith.constant 0 : i32
    return %c0_i32, %c0_i32_0 : i32, i32
  }
  func.func @transform_7(%arg0: i32) -> (i32, i32) {
    %c0_i32 = arith.constant 0 : i32
    %c0_i32_0 = arith.constant 0 : i32
    return %arg0, %c0_i32 : i32, i32
  }
}

</mosaic_0001>

<bundles_post_ra>
// kernel: tpu_custom_call.1
= control target key start
LH: loop header
LB: loop body
LE: loop exit
PB: predicated region body
PF: predicated region fallthrough
CT: control target
= control target key end

     0   :  { %12 = vsyncpa [#allocation3], 0  ;;  %s3523_s0 = inlined_call_operand.hbm [shape: f32[8,1000], index: 0, kind: input, shape index: {}]   ;;  %s3524_s1 = inlined_call_operand.hbm [shape: bf16[1000,512], index: 1, kind: input, shape index: {}]   ;;  %s3525_s2 = inlined_call_operand.hbm [shape: f32[1,512], index: 2, kind: input, shape index: {}]   ;;  %s3526_s3 = inlined_call_operand.hbm [shape: bf16[512,128], index: 3, kind: input, shape index: {}]   ;;  %s3527_s4 = inlined_call_operand.vmem [shape: f32[1,128], index: 4, kind: input, shape index: {}]   ;;  %s3528_s5 = inlined_call_operand.hbm [shape: bf16[128,128], index: 5, kind: input, shape index: {}]   ;;  %s3529_s6 = inlined_call_operand.vmem [shape: f32[1,128], index: 6, kind: input, shape index: {}]   ;;  %s3530_s7 = inlined_call_operand.hbm [shape: bf16[8,128], index: 7, kind: output, shape index: {}]  }
   0x1   :  { %13 = vsyncpa [#allocation6], 0 }
   0x2   :  { %14 = vsyncpa [#allocation9], 0 }
   0x3   :  { %15 = vsyncpa [#allocation4], 0  ;;  %s3385_s24 = smov [#allocation5]  }
   0x4   :  { %s31_s25 = sshll.u32 %s3385_s24, 4  ;;  %s32_s25 = int_to_ptr.vmem [resolvable:$true] %s31_s25 }
   0x5   :  { %s3265_s26 = scalar_lea.vmem %s32_s25, 32000  ;;  %p3270_p1 = scmp.lt.s32.totalorder %s32_s25, %s32_s25 }
   0x6   :  { %p3266_p0 = scmp.ne.s32.totalorder %s32_s25, %s3265_s26  ;;  %p3271_p2 = scmp.lt.s32.totalorder %s3265_s26, %s3265_s26 }
   0x8   :  { %p3272_p3 = por %p3271_p2, %p3270_p1 }
   0xa   :  { %p3273_p4 = pnand %p3272_p3, %p3266_p0 }
   0xc   :  { %3276 = shalt.err (!%p3273_p4)
}
   0xd   :  { %s3386_s27 = smov 256   ;;  %s3387_s28 = smov 16  }
   0xe   :  { %37 = dma.hbm_to_vmem [thread:$0]  %s3524_s1, 32000, %s32_s25, [#allocation6], %s3386_s27, %s3386_s27, %s3387_s28  }
   0xf   :  { %s3388_s8 = smov [#allocation8]  }
  0x10   :  { %s53_s9 = sshll.u32 %s3388_s8, 4  ;;  %s54_s9 = int_to_ptr.vmem [resolvable:$true] %s53_s9 }
  0x11   :  { %s3285_s10 = scalar_lea.vmem %s54_s9, 4096  ;;  %p3290_p6 = scmp.lt.s32.totalorder %s54_s9, %s54_s9 }
  0x12   :  { %p3286_p5 = scmp.ne.s32.totalorder %s54_s9, %s3285_s10  ;;  %p3291_p7 = scmp.lt.s32.totalorder %s3285_s10, %s3285_s10 }
  0x14   :  { %p3292_p8 = por %p3291_p7, %p3290_p6 }
  0x16   :  { %p3293_p9 = pnand %p3292_p8, %p3286_p5 }
  0x18   :  { %3296 = shalt.err (!%p3293_p9)
}
  0x19   :  { %s3389_s11 = smov 64   ;;  %s3390_s12 = smov 4  }
  0x1a   :  { %59 = dma.hbm_to_vmem [thread:$0]  %s3526_s3, 4096, %s54_s9, [#allocation9], %s3389_s11, %s3389_s11, %s3390_s12  }
  0x1b   :  { %s3391_s1 = smov [#allocation2]   ;;  %s3392_s16 = smov [#allocation7]  }
  0x1c   :  { %s22_s15 = sshll.u32 %s3391_s1, 4  ;;  %s44_s17 = sshll.u32 %s3392_s16, 4  ;;  %s23_s15 = int_to_ptr.vmem [resolvable:$true] %s22_s15  ;;  %s45_s17 = int_to_ptr.vmem [resolvable:$true] %s44_s17 }
  0x1d   :  { %s3305_s18 = scalar_lea.vmem %s23_s15, 1024  ;;  %p3310_p11 = scmp.lt.s32.totalorder %s23_s15, %s23_s15 }
  0x1e   :  { %p3306_p10 = scmp.ne.s32.totalorder %s23_s15, %s3305_s18  ;;  %p3311_p12 = scmp.lt.s32.totalorder %s3305_s18, %s3305_s18 }
  0x20   :  { %p3312_p13 = por %p3311_p12, %p3310_p11 }
  0x22   :  { %p3313_p0 = pnand %p3312_p13, %p3306_p10 }
  0x24   :  { %3316 = shalt.err (!%p3313_p0)
}
  0x25   :  { %25 = dma.hbm_to_vmem [thread:$0]  %s3523_s0, 1024, %s23_s15, [#allocation3]  }
  0x26   :  { %s3325_s21 = scalar_lea.vmem %s45_s17, 64  ;;  %p3330_p2 = scmp.lt.s32.totalorder %s45_s17, %s45_s17 }
  0x27   :  { %p3326_p1 = scmp.ne.s32.totalorder %s45_s17, %s3325_s21  ;;  %p3331_p3 = scmp.lt.s32.totalorder %s3325_s21, %s3325_s21 }
  0x29   :  { %p3332_p4 = por %p3331_p3, %p3330_p2 }
  0x2b   :  { %p3333_p5 = pnand %p3332_p4, %p3326_p1 }
  0x2d   :  { %3336 = shalt.err (!%p3333_p5)
}
  0x2e   :  { %47 = dma.hbm_to_vmem [thread:$0]  %s3525_s2, 64, %s45_s17, [#allocation6]  }
  0x2f   :  { %s3393_s23 = smov [#allocation10]  }
  0x30   :  { %s67_s24 = sshll.u32 %s3393_s23, 4  ;;  %s68_s24 = int_to_ptr.vmem [resolvable:$true] %s67_s24 }
  0x31   :  { %s3345_s25 = scalar_lea.vmem %s68_s24, 1024  ;;  %p3350_p7 = scmp.lt.s32.totalorder %s68_s24, %s68_s24 }
  0x32   :  { %p3346_p6 = scmp.ne.s32.totalorder %s68_s24, %s3345_s25  ;;  %p3351_p8 = scmp.lt.s32.totalorder %s3345_s25, %s3345_s25 }
  0x34   :  { %p3352_p9 = por %p3351_p8, %p3350_p7 }
  0x36   :  { %p3353_p10 = pnand %p3352_p9, %p3346_p6 }
  0x38   :  { %3356 = shalt.err (!%p3353_p10)
}
  0x39   :  { %73 = dma.hbm_to_vmem [thread:$0]  %s3528_s5, 1024, %s68_s24, [#allocation9], %s3389_s11, %s3389_s11, %s3390_s12  }
  0x3a   :  { %3377 = dma.done.wait [#allocation3], 1024  }
  0x3b   :  { %3378 = vsyncadd [#allocation3], 4294966272 }
  0x3c   :  { %3379 = dma.done.wait [#allocation6], 32064  }
  0x3d   :  { %3380 = vsyncadd [#allocation6], 4294935232 }
  0x3e   :  { %3381 = dma.done.wait [#allocation9], 5120  }
  0x3f   :  { %3382 = vsyncadd [#allocation9], 4294962176  ;;  %v2841_v0 = vld [vmem:[#allocation5 + $0xe4] ss:$16 sps:$4 sm:$0xff]   ;;  %v2845_v2 = vld [vmem:[#allocation5 + $0xe0] ss:$16 sps:$4 sm:$0xff]  }
  0x40   :  { %v2843_v1 = vld [vmem:[#allocation5 + $0x2e4] ss:$16 sps:$4 sm:$0xff]   ;;  %1647 = vmatprep.subr.bf16.mxu0 %v2841_v0  ;;  %v2846_v3 = vld [vmem:[#allocation5 + $0x2e0] ss:$16 sps:$4 sm:$0xff]   ;;  %v93_v46 = vld [vmem:[#allocation2 + $0x8] sm:$0xff]  ;;  %vm1630_vm0 = vcmask 850944  }
  0x41   :  { %1688 = vmatprep.subr.bf16.mxu1 %v2843_v1  ;;  %v2847_v4 = vld [vmem:[#allocation5 + $0xc4] ss:$16 sps:$4 sm:$0xff]   ;;  %1648 = vmatpush1.bf16.msra.mxu0 %v2845_v2  ;;  %v2851_v6 = vld [vmem:[#allocation5 + $0xc0] ss:$16 sps:$4 sm:$0xff]   ;;  %v3458_v49 = vpack.c.bf16 %v93_v46, %v93_v46  ;;  %v95_v50 = vld [vmem:[#allocation2 + $0x18] sm:$0xff]  ;;  %vm1634_vm1 = vcmask 1043456  }
  0x42   :  { %1689 = vmatpush1.bf16.msra.mxu1 %v2846_v3  ;;  %v2849_v5 = vld [vmem:[#allocation5 + $0x2c4] ss:$16 sps:$4 sm:$0xff]   ;;  %1649 = vmatprep.subr.bf16.mxu0 %v2847_v4  ;;  %v2852_v7 = vld [vmem:[#allocation5 + $0x2c0] ss:$16 sps:$4 sm:$0xff]   ;;  %v3460_v52 = vpack.c.bf16 %v95_v50, %v95_v50  ;;  %vm3395_vm2 = vmmov 0   ;;  %s3396_s29 = smov [#allocation11]  }
  0x43   :  { %1690 = vmatprep.subr.bf16.mxu1 %v2849_v5  ;;  %v2853_v8 = vld [vmem:[#allocation5 + $0xa4] ss:$16 sps:$4 sm:$0xff]   ;;  %v2857_v10 = vld [vmem:[#allocation5 + $0xa0] ss:$16 sps:$4 sm:$0xff]   ;;  %1679 = vmatprep.mubr.bf16.mxu0 %v3458_v49  ;;  %s2447_s30 = sshll.u32 %s3396_s29, 4  ;;  %s2448_s30 = int_to_ptr.vmem [resolvable:$true] %s2447_s30 }
  0x44   :  { %v2855_v9 = vld [vmem:[#allocation5 + $0x2a4] ss:$16 sps:$4 sm:$0xff]   ;;  %v2858_v11 = vld [vmem:[#allocation5 + $0x2a0] ss:$16 sps:$4 sm:$0xff]   ;;  %1720 = vmatprep.mubr.bf16.mxu1 %v3460_v52  ;;  %p3362_p12 = scmp.lt.s32.totalorder %s2448_s30, %s2448_s30 }
  0x45   :  { %1650 = vmatpush1.bf16.msra.mxu0 %v2851_v6  ;;  %v2859_v12 = vld [vmem:[#allocation5 + $0x84] ss:$16 sps:$4 sm:$0xff]   ;;  %v2863_v14 = vld [vmem:[#allocation5 + $0x80] ss:$16 sps:$4 sm:$0xff]  }
  0x46   :  { %1691 = vmatpush1.bf16.msra.mxu1 %v2852_v7  ;;  %1651 = vmatprep.subr.bf16.mxu0 %v2853_v8  ;;  %v2861_v13 = vld [vmem:[#allocation5 + $0x284] ss:$16 sps:$4 sm:$0xff]   ;;  %v2864_v15 = vld [vmem:[#allocation5 + $0x280] ss:$16 sps:$4 sm:$0xff]  }
  0x47   :  { %1692 = vmatprep.subr.bf16.mxu1 %v2855_v9  ;;  %v2865_v16 = vld [vmem:[#allocation5 + $0x64] ss:$16 sps:$4 sm:$0xff]   ;;  %v2869_v18 = vld [vmem:[#allocation5 + $0x60] ss:$16 sps:$4 sm:$0xff]  }
  0x48   :  { %v2867_v17 = vld [vmem:[#allocation5 + $0x264] ss:$16 sps:$4 sm:$0xff]   ;;  %v2870_v19 = vld [vmem:[#allocation5 + $0x260] ss:$16 sps:$4 sm:$0xff]  }
  0x49   :  { %1652 = vmatpush1.bf16.msra.mxu0 %v2857_v10  ;;  %v2871_v20 = vld [vmem:[#allocation5 + $0x44] ss:$16 sps:$4 sm:$0xff]   ;;  %v2875_v22 = vld [vmem:[#allocation5 + $0x40] ss:$16 sps:$4 sm:$0xff]  }
  0x4a   :  { %1693 = vmatpush1.bf16.msra.mxu1 %v2858_v11  ;;  %1653 = vmatprep.subr.bf16.mxu0 %v2859_v12  ;;  %v2873_v21 = vld [vmem:[#allocation5 + $0x244] ss:$16 sps:$4 sm:$0xff]   ;;  %v2876_v23 = vld [vmem:[#allocation5 + $0x240] ss:$16 sps:$4 sm:$0xff]  }
  0x4b   :  { %1694 = vmatprep.subr.bf16.mxu1 %v2861_v13  ;;  %v2877_v24 = vld [vmem:[#allocation5 + $0x24] ss:$16 sps:$4 sm:$0xff]   ;;  %v2881_v26 = vld [vmem:[#allocation5 + $0x20] ss:$16 sps:$4 sm:$0xff]  }
  0x4c   :  { %v2879_v25 = vld [vmem:[#allocation5 + $0x224] ss:$16 sps:$4 sm:$0xff]   ;;  %v2882_v27 = vld [vmem:[#allocation5 + $0x220] ss:$16 sps:$4 sm:$0xff]  }
  0x4d   :  { %1654 = vmatpush1.bf16.msra.mxu0 %v2863_v14  ;;  %v2883_v28 = vld [vmem:[#allocation5 + $0x4] ss:$16 sps:$4 sm:$0xff]   ;;  %v2887_v30 = vld [vmem:[#allocation5] ss:$16 sps:$4 sm:$0xff]  }
  0x4e   :  { %1695 = vmatpush1.bf16.msra.mxu1 %v2864_v15  ;;  %1655 = vmatprep.subr.bf16.mxu0 %v2865_v16  ;;  %v2885_v29 = vld [vmem:[#allocation5 + $0x204] ss:$16 sps:$4 sm:$0xff]   ;;  %v2888_v31 = vld [vmem:[#allocation5 + $0x200] ss:$16 sps:$4 sm:$0xff]  }
  0x4f   :  { %1696 = vmatprep.subr.bf16.mxu1 %v2867_v17  ;;  %v2889_v32 = vld [vmem:[#allocation5 + $0x1e4] ss:$16 sps:$4 sm:$0xff]   ;;  %v2893_v34 = vld [vmem:[#allocation5 + $0x1e0] ss:$16 sps:$4 sm:$0xff]  }
  0x50   :  { %v2891_v33 = vld [vmem:[#allocation5 + $0x3e4] ss:$16 sps:$4 sm:$0xff]   ;;  %v2894_v35 = vld [vmem:[#allocation5 + $0x3e0] ss:$16 sps:$4 sm:$0xff]  }
  0x51   :  { %1656 = vmatpush1.bf16.msra.mxu0 %v2869_v18  ;;  %v2895_v36 = vld [vmem:[#allocation5 + $0x1c4] ss:$16 sps:$4 sm:$0xff]   ;;  %v2899_v38 = vld [vmem:[#allocation5 + $0x1c0] ss:$16 sps:$4 sm:$0xff]  }
  0x52   :  { %1697 = vmatpush1.bf16.msra.mxu1 %v2870_v19  ;;  %1657 = vmatprep.subr.bf16.mxu0 %v2871_v20  ;;  %v2897_v37 = vld [vmem:[#allocation5 + $0x3c4] ss:$16 sps:$4 sm:$0xff]   ;;  %v2900_v39 = vld [vmem:[#allocation5 + $0x3c0] ss:$16 sps:$4 sm:$0xff]  }
  0x53   :  { %1698 = vmatprep.subr.bf16.mxu1 %v2873_v21  ;;  %v2901_v40 = vld [vmem:[#allocation5 + $0x1a4] ss:$16 sps:$4 sm:$0xff]   ;;  %v2905_v42 = vld [vmem:[#allocation5 + $0x1a0] ss:$16 sps:$4 sm:$0xff]  }
  0x54   :  { %v2903_v41 = vld [vmem:[#allocation5 + $0x3a4] ss:$16 sps:$4 sm:$0xff]   ;;  %v2906_v43 = vld [vmem:[#allocation5 + $0x3a0] ss:$16 sps:$4 sm:$0xff]  }
  0x55   :  { %1658 = vmatpush1.bf16.msra.mxu0 %v2875_v22  ;;  %v2907_v44 = vld [vmem:[#allocation5 + $0x184] ss:$16 sps:$4 sm:$0xff]   ;;  %v2911_v47 = vld [vmem:[#allocation5 + $0x180] ss:$16 sps:$4 sm:$0xff]  }
  0x56   :  { %1699 = vmatpush1.bf16.msra.mxu1 %v2876_v23  ;;  %1659 = vmatprep.subr.bf16.mxu0 %v2877_v24  ;;  %v2909_v45 = vld [vmem:[#allocation5 + $0x384] ss:$16 sps:$4 sm:$0xff]   ;;  %v2912_v48 = vld [vmem:[#allocation5 + $0x380] ss:$16 sps:$4 sm:$0xff]  }
  0x57   :  { %1700 = vmatprep.subr.bf16.mxu1 %v2879_v25  ;;  %v2913_v51 = vld [vmem:[#allocation5 + $0x164] ss:$16 sps:$4 sm:$0xff]   ;;  %v2917_v54 = vld [vmem:[#allocation5 + $0x160] ss:$16 sps:$4 sm:$0xff]  }
  0x58   :  { %v2915_v53 = vld [vmem:[#allocation5 + $0x364] ss:$16 sps:$4 sm:$0xff]   ;;  %v2918_v55 = vld [vmem:[#allocation5 + $0x360] ss:$16 sps:$4 sm:$0xff]  }
  0x59   :  { %1660 = vmatpush1.bf16.msra.mxu0 %v2881_v26  ;;  %v2919_v56 = vld [vmem:[#allocation5 + $0x144] ss:$16 sps:$4 sm:$0xff]   ;;  %v2923_v58 = vld [vmem:[#allocation5 + $0x140] ss:$16 sps:$4 sm:$0xff]  }
  0x5a   :  { %1701 = vmatpush1.bf16.msra.mxu1 %v2882_v27  ;;  %1661 = vmatprep.subr.bf16.mxu0 %v2883_v28  ;;  %v2921_v57 = vld [vmem:[#allocation5 + $0x344] ss:$16 sps:$4 sm:$0xff]   ;;  %v2924_v59 = vld [vmem:[#allocation5 + $0x340] ss:$16 sps:$4 sm:$0xff]  }
  0x5b   :  { %1702 = vmatprep.subr.bf16.mxu1 %v2885_v29  ;;  %v2925_v60 = vld [vmem:[#allocation5 + $0x124] ss:$16 sps:$4 sm:$0xff]   ;;  %v2929_v62 = vld [vmem:[#allocation5 + $0x120] ss:$16 sps:$4 sm:$0xff]  }
  0x5c   :  { %v2927_v61 = vld [vmem:[#allocation5 + $0x324] ss:$16 sps:$4 sm:$0xff]   ;;  %v2930_v63 = vld [vmem:[#allocation5 + $0x320] ss:$16 sps:$4 sm:$0xff]  }
  0x5d   :  { %1662 = vmatpush1.bf16.msra.mxu0 %v2887_v30  ;;  %v2931_v0 = vld [vmem:[#allocation5 + $0x104] ss:$16 sps:$4 sm:$0xff]   ;;  %v2935_v2 = vld [vmem:[#allocation5 + $0x100] ss:$16 sps:$4 sm:$0xff]   ;;  %v99_v30 = vld [vmem:[#allocation2 + $0x38] sm:$0xff] }
  0x5e   :  { %1703 = vmatpush1.bf16.msra.mxu1 %v2888_v31  ;;  %1663 = vmatprep.subr.bf16.mxu0 %v2889_v32  ;;  %v2933_v1 = vld [vmem:[#allocation5 + $0x304] ss:$16 sps:$4 sm:$0xff]   ;;  %v2936_v3 = vld [vmem:[#allocation5 + $0x300] ss:$16 sps:$4 sm:$0xff]  }
  0x5f   :  { %1704 = vmatprep.subr.bf16.mxu1 %v2891_v33  ;;  %v92_v4 = vld [vmem:[#allocation2] sm:$0xff]  ;;  %v94_v5 = vld [vmem:[#allocation2 + $0x10] sm:$0xff] }
  0x60   :  { %v2939_v6 = vld [vmem:[#allocation5 + $0x4e4] ss:$16 sps:$4 sm:$0xff]   ;;  %v3464_v8 = vpack.c.bf16 %v92_v4, %v92_v4  ;;  %v3466_v9 = vpack.c.bf16 %v94_v5, %v94_v5  ;;  %v2937_v10 = vld [vmem:[#allocation5 + $0x4e0] ss:$16 sps:$4 sm:$0xff]  }
  0x61   :  { %1664 = vmatpush2.bf16.msra.mxu0 %v2893_v34  ;;  %v2942_v7 = vld [vmem:[#allocation5 + $0x6e4] ss:$16 sps:$4 sm:$0xff]   ;;  %v2940_v11 = vld [vmem:[#allocation5 + $0x6e0] ss:$16 sps:$4 sm:$0xff]   ;;  %v3470_v34 = vpack.c.bf16 %v99_v30, %v99_v30  ;;  %v3046_v30 = vld [vmem:[#allocation5 + $0x8c] ss:$16 sps:$4 sm:$0xff]  }
  0x62   :  { %1705 = vmatpush2.bf16.msra.mxu1 %v2894_v35  ;;  %1665 = vmatprep.subr.bf16.mxu0 %v2895_v36  ;;  %v2945_v12 = vld [vmem:[#allocation5 + $0x4c4] ss:$16 sps:$4 sm:$0xff]   ;;  %v2943_v14 = vld [vmem:[#allocation5 + $0x4c0] ss:$16 sps:$4 sm:$0xff]   ;;  %v97_v36 = vld [vmem:[#allocation2 + $0x28] sm:$0xff] }
  0x63   :  { %1706 = vmatprep.subr.bf16.mxu1 %v2897_v37  ;;  %v2948_v13 = vld [vmem:[#allocation5 + $0x6c4] ss:$16 sps:$4 sm:$0xff]   ;;  %v2946_v15 = vld [vmem:[#allocation5 + $0x6c0] ss:$16 sps:$4 sm:$0xff]  }
  0x64   :  { %v2951_v16 = vld [vmem:[#allocation5 + $0x4a4] ss:$16 sps:$4 sm:$0xff]   ;;  %v2949_v18 = vld [vmem:[#allocation5 + $0x4a0] ss:$16 sps:$4 sm:$0xff]  }
  0x65   :  { %1666 = vmatpush2.bf16.msra.mxu0 %v2899_v38  ;;  %v2954_v17 = vld [vmem:[#allocation5 + $0x6a4] ss:$16 sps:$4 sm:$0xff]   ;;  %v2952_v19 = vld [vmem:[#allocation5 + $0x6a0] ss:$16 sps:$4 sm:$0xff]   ;;  %v3474_v38 = vpack.c.bf16 %v97_v36, %v97_v36  ;;  %v3050_v36 = vld [vmem:[#allocation5 + $0x68] ss:$16 sps:$4 sm:$0xff]  }
  0x66   :  { %1707 = vmatpush2.bf16.msra.mxu1 %v2900_v39  ;;  %1667 = vmatprep.subr.bf16.mxu0 %v2901_v40  ;;  %v2957_v20 = vld [vmem:[#allocation5 + $0x484] ss:$16 sps:$4 sm:$0xff]   ;;  %v2955_v22 = vld [vmem:[#allocation5 + $0x480] ss:$16 sps:$4 sm:$0xff]  }
  0x67   :  { %1708 = vmatprep.subr.bf16.mxu1 %v2903_v41  ;;  %v2960_v21 = vld [vmem:[#allocation5 + $0x684] ss:$16 sps:$4 sm:$0xff]   ;;  %v2958_v23 = vld [vmem:[#allocation5 + $0x680] ss:$16 sps:$4 sm:$0xff]  }
  0x68   :  { %v2963_v24 = vld [vmem:[#allocation5 + $0x464] ss:$16 sps:$4 sm:$0xff]   ;;  %v2961_v26 = vld [vmem:[#allocation5 + $0x460] ss:$16 sps:$4 sm:$0xff]  }
  0x69   :  { %1668 = vmatpush2.bf16.msra.mxu0 %v2905_v42  ;;  %v2966_v25 = vld [vmem:[#allocation5 + $0x664] ss:$16 sps:$4 sm:$0xff]   ;;  %v2964_v27 = vld [vmem:[#allocation5 + $0x660] ss:$16 sps:$4 sm:$0xff]  }
  0x6a   :  { %1709 = vmatpush2.bf16.msra.mxu1 %v2906_v43  ;;  %1669 = vmatprep.subr.bf16.mxu0 %v2907_v44  ;;  %v2969_v28 = vld [vmem:[#allocation5 + $0x444] ss:$16 sps:$4 sm:$0xff]   ;;  %v2967_v31 = vld [vmem:[#allocation5 + $0x440] ss:$16 sps:$4 sm:$0xff]  }
  0x6b   :  { %1710 = vmatprep.subr.bf16.mxu1 %v2909_v45  ;;  %v2972_v29 = vld [vmem:[#allocation5 + $0x644] ss:$16 sps:$4 sm:$0xff]   ;;  %v2970_v32 = vld [vmem:[#allocation5 + $0x640] ss:$16 sps:$4 sm:$0xff]  }
  0x6c   :  { %v2975_v33 = vld [vmem:[#allocation5 + $0x424] ss:$16 sps:$4 sm:$0xff]   ;;  %v2973_v37 = vld [vmem:[#allocation5 + $0x420] ss:$16 sps:$4 sm:$0xff]  }
  0x6d   :  { %1670 = vmatpush2.bf16.msra.mxu0 %v2911_v47  ;;  %v2978_v35 = vld [vmem:[#allocation5 + $0x624] ss:$16 sps:$4 sm:$0xff]   ;;  %v2976_v39 = vld [vmem:[#allocation5 + $0x620] ss:$16 sps:$4 sm:$0xff]  }
  0x6e   :  { %1711 = vmatpush2.bf16.msra.mxu1 %v2912_v48  ;;  %1671 = vmatprep.subr.bf16.mxu0 %v2913_v51  ;;  %v2981_v40 = vld [vmem:[#allocation5 + $0x404] ss:$16 sps:$4 sm:$0xff]   ;;  %v2979_v43 = vld [vmem:[#allocation5 + $0x400] ss:$16 sps:$4 sm:$0xff]  }
  0x6f   :  { %1712 = vmatprep.subr.bf16.mxu1 %v2915_v53  ;;  %v2984_v41 = vld [vmem:[#allocation5 + $0x604] ss:$16 sps:$4 sm:$0xff]   ;;  %v2982_v44 = vld [vmem:[#allocation5 + $0x600] ss:$16 sps:$4 sm:$0xff]  }
  0x70   :  { %v356_v42 = vld [vmem:[#allocation5 + $0x7c0] sm:$0xff] }
  0x71   :  { %1672 = vmatpush2.bf16.msra.mxu0 %v2917_v54  ;;  %v2987_v45 = vld [vmem:[#allocation5 + $0x5e4] ss:$16 sps:$4 sm:$0xff]   ;;  %v2707_v46 = vcombine.high %v356_v42, %v356_v42  ;;  %v2706_v47 = vcombine.low %v356_v42, %v356_v42  ;;  %v2985_v48 = vld [vmem:[#allocation5 + $0x5e0] ss:$16 sps:$4 sm:$0xff]   ;;  %v3064_v42 = vld [vmem:[#allocation5 + $0x2c] ss:$16 sps:$4 sm:$0xff]  }
  0x72   :  { %1713 = vmatpush2.bf16.msra.mxu1 %v2918_v55  ;;  %1673 = vmatprep.subr.bf16.mxu0 %v2919_v56  ;;  %v2992_v51 = vld [vmem:[#allocation5 + $0x5c4] ss:$16 sps:$4 sm:$0xff]   ;;  %v2990_v54 = vld [vmem:[#allocation5 + $0x5c0] ss:$16 sps:$4 sm:$0xff]  }
  0x73   :  { %1714 = vmatprep.subr.bf16.mxu1 %v2921_v57  ;;  %v1636_v50 = vsel %vm1634_vm1, %v2706_v47, 0  ;;  %v2995_v53 = vld [vmem:[#allocation5 + $0x7a4] ss:$16 sps:$4 sm:$0xff]   ;;  %v2993_v55 = vld [vmem:[#allocation5 + $0x7a0] ss:$16 sps:$4 sm:$0xff]  }
  0x74   :  { %v2998_v56 = vld [vmem:[#allocation5 + $0x5a4] ss:$16 sps:$4 sm:$0xff]   ;;  %v3073_v47 = vld [vmem:[#allocation5 + $0x22c] ss:$16 sps:$4 sm:$0xff]  }
  0x75   :  { %1674 = vmatpush2.bf16.msra.mxu0 %v2923_v58  ;;  %v3001_v57 = vld [vmem:[#allocation5 + $0x784] ss:$16 sps:$4 sm:$0xff]   ;;  %v2996_v58 = vld [vmem:[#allocation5 + $0x5a0] ss:$16 sps:$4 sm:$0xff]  }
  0x76   :  { %1715 = vmatpush2.bf16.msra.mxu1 %v2924_v59  ;;  %1675 = vmatprep.subr.bf16.mxu0 %v2925_v60  ;;  %v2999_v59 = vld [vmem:[#allocation5 + $0x780] ss:$16 sps:$4 sm:$0xff]   ;;  %v3004_v60 = vld [vmem:[#allocation5 + $0x584] ss:$16 sps:$4 sm:$0xff]  }
  0x77   :  { %1716 = vmatprep.subr.bf16.mxu1 %v2927_v61  ;;  %v3007_v61 = vld [vmem:[#allocation5 + $0x764] ss:$16 sps:$4 sm:$0xff]  }
  0x78   :  { %v3016_v4 = vld [vmem:[#allocation5 + $0x544] ss:$16 sps:$4 sm:$0xff]  }
  0x79   :  { %1676 = vmatpush2.bf16.msra.mxu0 %v2929_v62  ;;  %v3002_v62 = vld [vmem:[#allocation5 + $0x580] ss:$16 sps:$4 sm:$0xff]   ;;  %v3019_v5 = vld [vmem:[#allocation5 + $0x724] ss:$16 sps:$4 sm:$0xff]  }
  0x7a   :  { %1717 = vmatpush2.bf16.msra.mxu1 %v2930_v63  ;;  %1677 = vmatprep.subr.bf16.mxu0 %v2931_v0  ;;  %v3005_v63 = vld [vmem:[#allocation5 + $0x760] ss:$16 sps:$4 sm:$0xff]   ;;  %v3010_v0 = vld [vmem:[#allocation5 + $0x564] ss:$16 sps:$4 sm:$0xff]  }
  0x7b   :  { %1718 = vmatprep.subr.bf16.mxu1 %v2933_v1  ;;  %v3013_v1 = vld [vmem:[#allocation5 + $0x744] ss:$16 sps:$4 sm:$0xff]  }
  0x7d   :  { %1678 = vmatpush2.bf16.msra.mxu0 %v2935_v2  ;;  %v3008_v2 = vld [vmem:[#allocation5 + $0x560] ss:$16 sps:$4 sm:$0xff]  }
  0x7e   :  { %1719 = vmatpush2.bf16.msra.mxu1 %v2936_v3  ;;  %1729 = vmatprep.subr.bf16.mxu0 %v2939_v6  ;;  %v3011_v3 = vld [vmem:[#allocation5 + $0x740] ss:$16 sps:$4 sm:$0xff]  }
  0x7f   :  { %1770 = vmatprep.subr.bf16.mxu1 %v2942_v7  ;;  %v3014_v6 = vld [vmem:[#allocation5 + $0x540] ss:$16 sps:$4 sm:$0xff]  }
  0x80   :  { %1680 = vmatmul.mubr.bf16.vlgmr.msra.gmra.mxu0 %v3464_v8  ;;  %v3017_v7 = vld [vmem:[#allocation5 + $0x720] ss:$16 sps:$4 sm:$0xff]  }
  0x81   :  { %1721 = vmatmul.mubr.bf16.vlgmr.msra.gmra.mxu1 %v3466_v9  ;;  %1730 = vmatpush1.bf16.msra.mxu0 %v2937_v10  ;;  %v3022_v10 = vld [vmem:[#allocation5 + $0x524] ss:$16 sps:$4 sm:$0xff]  }
  0x82   :  { %1771 = vmatpush1.bf16.msra.mxu1 %v2940_v11  ;;  %1731 = vmatprep.subr.bf16.mxu0 %v2945_v12  ;;  %v3025_v11 = vld [vmem:[#allocation5 + $0x704] ss:$16 sps:$4 sm:$0xff]   ;;  %v3020_v12 = vld [vmem:[#allocation5 + $0x520] ss:$16 sps:$4 sm:$0xff]  }
  0x83   :  { %1772 = vmatprep.subr.bf16.mxu1 %v2948_v13  ;;  %2711 = vmatprep.mubr.msk.bf16.mxu1 %vm1630_vm0, %v3470_v34  ;;  %v3023_v13 = vld [vmem:[#allocation5 + $0x700] ss:$16 sps:$4 sm:$0xff]  }
  0x84   :  { %1761 = vmatprep.mubr.bf16.mxu0 %v3474_v38 }
  0x85   :  { %1732 = vmatpush1.bf16.msra.mxu0 %v2943_v14  ;;  %v98_v14 = vld [vmem:[#allocation2 + $0x30] sm:$0xff] }
  0x86   :  { %1773 = vmatpush1.bf16.msra.mxu1 %v2946_v15  ;;  %1733 = vmatprep.subr.bf16.mxu0 %v2951_v16  ;;  %v3028_v15 = vld [vmem:[#allocation5 + $0x504] ss:$16 sps:$4 sm:$0xff]   ;;  %v3031_v16 = vld [vmem:[#allocation5 + $0xec] ss:$16 sps:$4 sm:$0xff]  }
  0x87   :  { %1774 = vmatprep.subr.bf16.mxu1 %v2954_v17  ;;  %v3026_v17 = vld [vmem:[#allocation5 + $0x500] ss:$16 sps:$4 sm:$0xff]  }
  0x89   :  { %1734 = vmatpush1.bf16.msra.mxu0 %v2949_v18  ;;  %v3479_v18 = vpack.c.bf16 %v98_v14, %v98_v14  ;;  %v3112_v14 = vld [vmem:[#allocation5 + $0x12c] ss:$16 sps:$4 sm:$0xff]  }
  0x8a   :  { %1775 = vmatpush1.bf16.msra.mxu1 %v2952_v19  ;;  %1735 = vmatprep.subr.bf16.mxu0 %v2957_v20  ;;  %v3029_v19 = vld [vmem:[#allocation5 + $0xe8] ss:$16 sps:$4 sm:$0xff]   ;;  %v96_v20 = vld [vmem:[#allocation2 + $0x20] sm:$0xff] }
  0x8b   :  { %1776 = vmatprep.subr.bf16.mxu1 %v2960_v21  ;;  %v3034_v21 = vld [vmem:[#allocation5 + $0xcc] ss:$16 sps:$4 sm:$0xff]  }
  0x8d   :  { %1736 = vmatpush1.bf16.msra.mxu0 %v2955_v22  ;;  %v3037_v22 = vld [vmem:[#allocation5 + $0x2ec] ss:$16 sps:$4 sm:$0xff]  }
  0x8e   :  { %1777 = vmatpush1.bf16.msra.mxu1 %v2958_v23  ;;  %1737 = vmatprep.subr.bf16.mxu0 %v2963_v24  ;;  %v3482_v23 = vpack.c.bf16 %v96_v20, %v96_v20  ;;  %v3032_v24 = vld [vmem:[#allocation5 + $0xc8] ss:$16 sps:$4 sm:$0xff]   ;;  %v3121_v20 = vld [vmem:[#allocation5 + $0x32c] ss:$16 sps:$4 sm:$0xff]  }
  0x8f   :  { %1778 = vmatprep.subr.bf16.mxu1 %v2966_v25  ;;  %v3035_v25 = vld [vmem:[#allocation5 + $0x2e8] ss:$16 sps:$4 sm:$0xff]  }
  0x91   :  { %1738 = vmatpush1.bf16.msra.mxu0 %v2961_v26  ;;  %v3040_v26 = vld [vmem:[#allocation5 + $0xac] ss:$16 sps:$4 sm:$0xff]  }
  0x92   :  { %1779 = vmatpush1.bf16.msra.mxu1 %v2964_v27  ;;  %1739 = vmatprep.subr.bf16.mxu0 %v2969_v28  ;;  %v3043_v27 = vld [vmem:[#allocation5 + $0x2cc] ss:$16 sps:$4 sm:$0xff]   ;;  %v3038_v28 = vld [vmem:[#allocation5 + $0xa8] ss:$16 sps:$4 sm:$0xff]  }
  0x93   :  { %1780 = vmatprep.subr.bf16.mxu1 %v2972_v29  ;;  %v3041_v29 = vld [vmem:[#allocation5 + $0x2c8] ss:$16 sps:$4 sm:$0xff]  }
  0x95   :  { %1740 = vmatpush1.bf16.msra.mxu0 %v2967_v31  ;;  %v3049_v31 = vld [vmem:[#allocation5 + $0x2ac] ss:$16 sps:$4 sm:$0xff]  }
  0x96   :  { %1781 = vmatpush1.bf16.msra.mxu1 %v2970_v32  ;;  %1741 = vmatprep.subr.bf16.mxu0 %v2975_v33  ;;  %v3044_v32 = vld [vmem:[#allocation5 + $0x88] ss:$16 sps:$4 sm:$0xff]  }
  0x97   :  { %1782 = vmatprep.subr.bf16.mxu1 %v2978_v35  ;;  %v3047_v33 = vld [vmem:[#allocation5 + $0x2a8] ss:$16 sps:$4 sm:$0xff]   ;;  %v3052_v35 = vld [vmem:[#allocation5 + $0x6c] ss:$16 sps:$4 sm:$0xff]  }
  0x99   :  { %1742 = vmatpush1.bf16.msra.mxu0 %v2973_v37  ;;  %v3053_v37 = vld [vmem:[#allocation5 + $0x288] ss:$16 sps:$4 sm:$0xff]  }
  0x9a   :  { %1783 = vmatpush1.bf16.msra.mxu1 %v2976_v39  ;;  %1743 = vmatprep.subr.bf16.mxu0 %v2981_v40  ;;  %v3058_v39 = vld [vmem:[#allocation5 + $0x4c] ss:$16 sps:$4 sm:$0xff]  }
  0x9b   :  { %1784 = vmatprep.subr.bf16.mxu1 %v2984_v41  ;;  %v3061_v40 = vld [vmem:[#allocation5 + $0x26c] ss:$16 sps:$4 sm:$0xff]   ;;  %v3056_v41 = vld [vmem:[#allocation5 + $0x48] ss:$16 sps:$4 sm:$0xff]  }
  0x9d   :  { %1744 = vmatpush1.bf16.msra.mxu0 %v2979_v43  ;;  %v3067_v43 = vld [vmem:[#allocation5 + $0x24c] ss:$16 sps:$4 sm:$0xff]  }
  0x9e   :  { %1785 = vmatpush1.bf16.msra.mxu1 %v2982_v44  ;;  %1745 = vmatprep.subr.bf16.mxu0 %v2987_v45  ;;  %v3062_v44 = vld [vmem:[#allocation5 + $0x28] ss:$16 sps:$4 sm:$0xff]  }
  0x9f   :  { %2710 = vmatprep.subr.msk.bf16.mxu1 %vm1634_vm1, %v2707_v46  ;;  %v3065_v45 = vld [vmem:[#allocation5 + $0x248] ss:$16 sps:$4 sm:$0xff]   ;;  %v3070_v46 = vld [vmem:[#allocation5 + $0xc] ss:$16 sps:$4 sm:$0xff]  }
  0xa1   :  { %1746 = vmatpush2.bf16.msra.mxu0 %v2985_v48  ;;  %v3068_v48 = vld [vmem:[#allocation5 + $0x8] ss:$16 sps:$4 sm:$0xff]  }
  0xa2   :  { %1789 = vmatpush2.bf16.msra.mxu1 %v1636_v50  ;;  %1747 = vmatprep.subr.bf16.mxu0 %v2992_v51  ;;  %v3071_v50 = vld [vmem:[#allocation5 + $0x228] ss:$16 sps:$4 sm:$0xff]   ;;  %v3076_v51 = vld [vmem:[#allocation5 + $0x1ec] ss:$16 sps:$4 sm:$0xff]  }
  0xa3   :  { %1790 = vmatprep.subr.bf16.mxu1 %v2995_v53  ;;  %v3079_v53 = vld [vmem:[#allocation5 + $0x20c] ss:$16 sps:$4 sm:$0xff]  }
  0xa5   :  { %1748 = vmatpush2.bf16.msra.mxu0 %v2990_v54  ;;  %v3074_v54 = vld [vmem:[#allocation5 + $0x1e8] ss:$16 sps:$4 sm:$0xff]  }
  0xa6   :  { %1791 = vmatpush2.bf16.msra.mxu1 %v2993_v55  ;;  %1749 = vmatprep.subr.bf16.mxu0 %v2998_v56  ;;  %v3077_v55 = vld [vmem:[#allocation5 + $0x208] ss:$16 sps:$4 sm:$0xff]   ;;  %v3082_v56 = vld [vmem:[#allocation5 + $0x1cc] ss:$16 sps:$4 sm:$0xff]  }
  0xa7   :  { %1792 = vmatprep.subr.bf16.mxu1 %v3001_v57  ;;  %v3085_v57 = vld [vmem:[#allocation5 + $0x3ec] ss:$16 sps:$4 sm:$0xff]  }
  0xa9   :  { %1750 = vmatpush2.bf16.msra.mxu0 %v2996_v58  ;;  %v3080_v58 = vld [vmem:[#allocation5 + $0x1c8] ss:$16 sps:$4 sm:$0xff]  }
  0xaa   :  { %1793 = vmatpush2.bf16.msra.mxu1 %v2999_v59  ;;  %1751 = vmatprep.subr.bf16.mxu0 %v3004_v60  ;;  %v3083_v59 = vld [vmem:[#allocation5 + $0x3e8] ss:$16 sps:$4 sm:$0xff]   ;;  %v3088_v60 = vld [vmem:[#allocation5 + $0x1ac] ss:$16 sps:$4 sm:$0xff]  }
  0xab   :  { %1794 = vmatprep.subr.bf16.mxu1 %v3007_v61  ;;  %v3091_v61 = vld [vmem:[#allocation5 + $0x3cc] ss:$16 sps:$4 sm:$0xff]  }
  0xad   :  { %1752 = vmatpush2.bf16.msra.mxu0 %v3002_v62  ;;  %v3086_v62 = vld [vmem:[#allocation5 + $0x1a8] ss:$16 sps:$4 sm:$0xff]  }
  0xae   :  { %1795 = vmatpush2.bf16.msra.mxu1 %v3005_v63  ;;  %1753 = vmatprep.subr.bf16.mxu0 %v3010_v0  ;;  %v3089_v63 = vld [vmem:[#allocation5 + $0x3c8] ss:$16 sps:$4 sm:$0xff]   ;;  %v3094_v0 = vld [vmem:[#allocation5 + $0x18c] ss:$16 sps:$4 sm:$0xff]  }
  0xaf   :  { %1796 = vmatprep.subr.bf16.mxu1 %v3013_v1  ;;  %v3097_v1 = vld [vmem:[#allocation5 + $0x3ac] ss:$16 sps:$4 sm:$0xff]  }
  0xb1   :  { %1754 = vmatpush2.bf16.msra.mxu0 %v3008_v2  ;;  %v3092_v2 = vld [vmem:[#allocation5 + $0x188] ss:$16 sps:$4 sm:$0xff]  }
  0xb2   :  { %1797 = vmatpush2.bf16.msra.mxu1 %v3011_v3  ;;  %1755 = vmatprep.subr.bf16.mxu0 %v3016_v4  ;;  %v3095_v3 = vld [vmem:[#allocation5 + $0x3a8] ss:$16 sps:$4 sm:$0xff]   ;;  %v3100_v4 = vld [vmem:[#allocation5 + $0x16c] ss:$16 sps:$4 sm:$0xff]  }
  0xb3   :  { %1798 = vmatprep.subr.bf16.mxu1 %v3019_v5  ;;  %v3103_v5 = vld [vmem:[#allocation5 + $0x38c] ss:$16 sps:$4 sm:$0xff]  }
  0xb5   :  { %1756 = vmatpush2.bf16.msra.mxu0 %v3014_v6  ;;  %v3098_v6 = vld [vmem:[#allocation5 + $0x168] ss:$16 sps:$4 sm:$0xff]  }
  0xb6   :  { %1799 = vmatpush2.bf16.msra.mxu1 %v3017_v7  ;;  %1757 = vmatprep.subr.bf16.mxu0 %v3022_v10  ;;  %v3101_v7 = vld [vmem:[#allocation5 + $0x388] ss:$16 sps:$4 sm:$0xff]   ;;  %v3106_v10 = vld [vmem:[#allocation5 + $0x14c] ss:$16 sps:$4 sm:$0xff]  }
  0xb7   :  { %1800 = vmatprep.subr.bf16.mxu1 %v3025_v11  ;;  %v3109_v11 = vld [vmem:[#allocation5 + $0x36c] ss:$16 sps:$4 sm:$0xff]  }
  0xb9   :  { %1758 = vmatpush2.bf16.msra.mxu0 %v3020_v12  ;;  %v3104_v12 = vld [vmem:[#allocation5 + $0x148] ss:$16 sps:$4 sm:$0xff]  }
  0xba   :  { %1801 = vmatpush2.bf16.msra.mxu1 %v3023_v13  ;;  %1759 = vmatprep.subr.bf16.mxu0 %v3028_v15  ;;  %v3107_v13 = vld [vmem:[#allocation5 + $0x368] ss:$16 sps:$4 sm:$0xff]   ;;  %v3115_v15 = vld [vmem:[#allocation5 + $0x34c] ss:$16 sps:$4 sm:$0xff]  }
  0xbb   :  { %1811 = vmatprep.subr.bf16.mxu1 %v3031_v16  ;;  %v3110_v16 = vld [vmem:[#allocation5 + $0x128] ss:$16 sps:$4 sm:$0xff]  }
  0xbd   :  { %1803 = vmatmul.mubr.bf16.vlgmr.msra.gmra.mxu1 %v3479_v18  ;;  %1760 = vmatpush2.bf16.msra.mxu0 %v3026_v17  ;;  %v3113_v17 = vld [vmem:[#allocation5 + $0x348] ss:$16 sps:$4 sm:$0xff]  }
  0xbe   :  { %1812 = vmatpush1.bf16.msra.mxu1 %v3029_v19  ;;  %1852 = vmatprep.subr.bf16.mxu0 %v3037_v22  ;;  %v3118_v19 = vld [vmem:[#allocation5 + $0x10c] ss:$16 sps:$4 sm:$0xff]   ;;  %v3119_v22 = vld [vmem:[#allocation5 + $0x328] ss:$16 sps:$4 sm:$0xff]  }
  0xbf   :  { %1813 = vmatprep.subr.bf16.mxu1 %v3034_v21  ;;  %1843 = vmatprep.mubr.bf16.mxu1 %v3458_v49  ;;  %v3055_v49 = vld [vmem:[#allocation5 + $0x28c] ss:$16 sps:$4 sm:$0xff]   ;;  %v3116_v21 = vld [vmem:[#allocation5 + $0x108] ss:$16 sps:$4 sm:$0xff]  }
  0xc0   :  { %1762 = vmatmul.mubr.bf16.vlgmr.msra.gmra.mxu0 %v3482_v23 }
  0xc1   :  { %1853 = vmatpush1.bf16.msra.mxu0 %v3035_v25  ;;  %1884 = vmatprep.mubr.bf16.mxu0 %v3460_v52  ;;  %v3059_v52 = vld [vmem:[#allocation5 + $0x268] ss:$16 sps:$4 sm:$0xff]   ;;  %v3127_v25 = vld [vmem:[#allocation5 + $0x4ec] ss:$16 sps:$4 sm:$0xff]  }
  0xc2   :  { %1814 = vmatpush1.bf16.msra.mxu1 %v3032_v24  ;;  %1854 = vmatprep.subr.bf16.mxu0 %v3043_v27  ;;  %v3124_v24 = vld [vmem:[#allocation5 + $0x30c] ss:$16 sps:$4 sm:$0xff]   ;;  %v3125_v27 = vld [vmem:[#allocation5 + $0x4e8] ss:$16 sps:$4 sm:$0xff]  }
  0xc3   :  { %1815 = vmatprep.subr.bf16.mxu1 %v3040_v26  ;;  %v3122_v26 = vld [vmem:[#allocation5 + $0x308] ss:$16 sps:$4 sm:$0xff]  }
  0xc5   :  { %1855 = vmatpush1.bf16.msra.mxu0 %v3041_v29  ;;  %v3133_v29 = vld [vmem:[#allocation5 + $0x6ec] ss:$16 sps:$4 sm:$0xff]  }
  0xc6   :  { %1816 = vmatpush1.bf16.msra.mxu1 %v3038_v28  ;;  %1856 = vmatprep.subr.bf16.mxu0 %v3049_v31  ;;  %v3130_v28 = vld [vmem:[#allocation5 + $0x4cc] ss:$16 sps:$4 sm:$0xff]   ;;  %v3131_v31 = vld [vmem:[#allocation5 + $0x6e8] ss:$16 sps:$4 sm:$0xff]  }
  0xc7   :  { %1817 = vmatprep.subr.bf16.mxu1 %v3046_v30  ;;  %v3128_v30 = vld [vmem:[#allocation5 + $0x4c8] ss:$16 sps:$4 sm:$0xff]  }
  0xc9   :  { %1857 = vmatpush1.bf16.msra.mxu0 %v3047_v33  ;;  %v3139_v33 = vld [vmem:[#allocation5 + $0x6cc] ss:$16 sps:$4 sm:$0xff]  }
  0xca   :  { %1818 = vmatpush1.bf16.msra.mxu1 %v3044_v32  ;;  %1858 = vmatprep.subr.bf16.mxu0 %v3055_v49  ;;  %v3136_v32 = vld [vmem:[#allocation5 + $0x4ac] ss:$16 sps:$4 sm:$0xff]   ;;  %v3137_v49 = vld [vmem:[#allocation5 + $0x6c8] ss:$16 sps:$4 sm:$0xff]  }
  0xcb   :  { %1819 = vmatprep.subr.bf16.mxu1 %v3052_v35  ;;  %v3134_v35 = vld [vmem:[#allocation5 + $0x4a8] ss:$16 sps:$4 sm:$0xff]  }
  0xcd   :  { %1859 = vmatpush1.bf16.msra.mxu0 %v3053_v37  ;;  %v3145_v37 = vld [vmem:[#allocation5 + $0x6ac] ss:$16 sps:$4 sm:$0xff]  }
  0xce   :  { %1820 = vmatpush1.bf16.msra.mxu1 %v3050_v36  ;;  %1860 = vmatprep.subr.bf16.mxu0 %v3061_v40  ;;  %v3142_v36 = vld [vmem:[#allocation5 + $0x48c] ss:$16 sps:$4 sm:$0xff]  }
  0xcf   :  { %1821 = vmatprep.subr.bf16.mxu1 %v3058_v39  ;;  %v3143_v39 = vld [vmem:[#allocation5 + $0x6a8] ss:$16 sps:$4 sm:$0xff]   ;;  %v3148_v40 = vld [vmem:[#allocation5 + $0x46c] ss:$16 sps:$4 sm:$0xff]  }
  0xd1   :  { %1861 = vmatpush1.bf16.msra.mxu0 %v3059_v52  ;;  %v3154_v52 = vld [vmem:[#allocation5 + $0x44c] ss:$16 sps:$4 sm:$0xff]  }
  0xd2   :  { %1822 = vmatpush1.bf16.msra.mxu1 %v3056_v41  ;;  %1862 = vmatprep.subr.bf16.mxu0 %v3067_v43  ;;  %v3151_v41 = vld [vmem:[#allocation5 + $0x68c] ss:$16 sps:$4 sm:$0xff]   ;;  %v3152_v43 = vld [vmem:[#allocation5 + $0x448] ss:$16 sps:$4 sm:$0xff]  }
  0xd3   :  { %1823 = vmatprep.subr.bf16.mxu1 %v3064_v42  ;;  %v3157_v42 = vld [vmem:[#allocation5 + $0x66c] ss:$16 sps:$4 sm:$0xff]  }
  0xd5   :  { %1863 = vmatpush1.bf16.msra.mxu0 %v3065_v45  ;;  %v3163_v45 = vld [vmem:[#allocation5 + $0x64c] ss:$16 sps:$4 sm:$0xff]  }
  0xd6   :  { %1824 = vmatpush1.bf16.msra.mxu1 %v3062_v44  ;;  %1864 = vmatprep.subr.bf16.mxu0 %v3073_v47  ;;  %v3160_v44 = vld [vmem:[#allocation5 + $0x42c] ss:$16 sps:$4 sm:$0xff]   ;;  %v3161_v47 = vld [vmem:[#allocation5 + $0x648] ss:$16 sps:$4 sm:$0xff]  }
  0xd7   :  { %1825 = vmatprep.subr.bf16.mxu1 %v3070_v46  ;;  %v3158_v46 = vld [vmem:[#allocation5 + $0x428] ss:$16 sps:$4 sm:$0xff]  }
  0xd9   :  { %1865 = vmatpush1.bf16.msra.mxu0 %v3071_v50  ;;  %v3169_v50 = vld [vmem:[#allocation5 + $0x62c] ss:$16 sps:$4 sm:$0xff]  }
  0xda   :  { %1826 = vmatpush1.bf16.msra.mxu1 %v3068_v48  ;;  %1866 = vmatprep.subr.bf16.mxu0 %v3079_v53  ;;  %v3166_v48 = vld [vmem:[#allocation5 + $0x40c] ss:$16 sps:$4 sm:$0xff]   ;;  %v3167_v53 = vld [vmem:[#allocation5 + $0x628] ss:$16 sps:$4 sm:$0xff]  }
  0xdb   :  { %1827 = vmatprep.subr.bf16.mxu1 %v3076_v51  ;;  %v3164_v51 = vld [vmem:[#allocation5 + $0x408] ss:$16 sps:$4 sm:$0xff]  }
  0xdd   :  { %1867 = vmatpush1.bf16.msra.mxu0 %v3077_v55  ;;  %v3175_v55 = vld [vmem:[#allocation5 + $0x60c] ss:$16 sps:$4 sm:$0xff]  }
  0xde   :  { %1828 = vmatpush2.bf16.msra.mxu1 %v3074_v54  ;;  %1868 = vmatprep.subr.bf16.mxu0 %v3085_v57  ;;  %v3172_v54 = vld [vmem:[#allocation5 + $0x5ec] ss:$16 sps:$4 sm:$0xff]   ;;  %v3170_v57 = vld [vmem:[#allocation5 + $0x5e8] ss:$16 sps:$4 sm:$0xff]  }
  0xdf   :  { %1829 = vmatprep.subr.bf16.mxu1 %v3082_v56  ;;  %v357_v56 = vld [vmem:[#allocation5 + $0x7c8] sm:$0xff] }
  0xe1   :  { %1869 = vmatpush2.bf16.msra.mxu0 %v3083_v59  ;;  %v3178_v59 = vld [vmem:[#allocation5 + $0x5cc] ss:$16 sps:$4 sm:$0xff]  }
  0xe2   :  { %1830 = vmatpush2.bf16.msra.mxu1 %v3080_v58  ;;  %1870 = vmatprep.subr.bf16.mxu0 %v3091_v61  ;;  %v3173_v58 = vld [vmem:[#allocation5 + $0x608] ss:$16 sps:$4 sm:$0xff]   ;;  %v2708_v61 = vcombine.low %v357_v56, %v357_v56 }
  0xe3   :  { %1831 = vmatprep.subr.bf16.mxu1 %v3088_v60  ;;  %v2709_v60 = vcombine.high %v357_v56, %v357_v56  ;;  %v3232_v56 = vld [vmem:[#allocation8] sm:$0xff]  }
  0xe5   :  { %1871 = vmatpush2.bf16.msra.mxu0 %v3089_v63  ;;  %v1642_v63 = vsel %vm1634_vm1, %v2708_v61, 0  ;;  %v3503_v61 = vld [vmem:[#allocation7] sm:$0xf] }
  0xe6   :  { %1832 = vmatpush2.bf16.msra.mxu1 %v3086_v62  ;;  %1872 = vmatprep.subr.bf16.mxu0 %v3097_v1  ;;  %v3176_v62 = vld [vmem:[#allocation5 + $0x5c8] ss:$16 sps:$4 sm:$0xff]   ;;  %v3186_v1 = vld [vmem:[#allocation5 + $0x7ac] ss:$16 sps:$4 sm:$0xff]  }
  0xe7   :  { %1833 = vmatprep.subr.bf16.mxu1 %v3094_v0  ;;  %v3183_v0 = vld [vmem:[#allocation5 + $0x5ac] ss:$16 sps:$4 sm:$0xff]  }
  0xe9   :  { %1873 = vmatpush2.bf16.msra.mxu0 %v3095_v3  ;;  %v3184_v3 = vld [vmem:[#allocation5 + $0x7a8] ss:$16 sps:$4 sm:$0xff]  }
  0xea   :  { %1834 = vmatpush2.bf16.msra.mxu1 %v3092_v2  ;;  %1874 = vmatprep.subr.bf16.mxu0 %v3103_v5  ;;  %v3181_v2 = vld [vmem:[#allocation5 + $0x5a8] ss:$16 sps:$4 sm:$0xff]   ;;  %v3192_v5 = vld [vmem:[#allocation5 + $0x78c] ss:$16 sps:$4 sm:$0xff]  }
  0xeb   :  { %1835 = vmatprep.subr.bf16.mxu1 %v3100_v4  ;;  %v3189_v4 = vld [vmem:[#allocation5 + $0x58c] ss:$16 sps:$4 sm:$0xff]  }
  0xed   :  { %1875 = vmatpush2.bf16.msra.mxu0 %v3101_v7  ;;  %v3190_v7 = vld [vmem:[#allocation5 + $0x788] ss:$16 sps:$4 sm:$0xff]  }
  0xee   :  { %1836 = vmatpush2.bf16.msra.mxu1 %v3098_v6  ;;  %1876 = vmatprep.subr.bf16.mxu0 %v3109_v11  ;;  %v3187_v6 = vld [vmem:[#allocation5 + $0x588] ss:$16 sps:$4 sm:$0xff]   ;;  %v3198_v11 = vld [vmem:[#allocation5 + $0x76c] ss:$16 sps:$4 sm:$0xff]  }
  0xef   :  { %1837 = vmatprep.subr.bf16.mxu1 %v3106_v10  ;;  %v3195_v10 = vld [vmem:[#allocation5 + $0x56c] ss:$16 sps:$4 sm:$0xff]  }
  0xf1   :  { %1877 = vmatpush2.bf16.msra.mxu0 %v3107_v13  ;;  %v3196_v13 = vld [vmem:[#allocation5 + $0x768] ss:$16 sps:$4 sm:$0xff]  }
  0xf2   :  { %1838 = vmatpush2.bf16.msra.mxu1 %v3104_v12  ;;  %1878 = vmatprep.subr.bf16.mxu0 %v3115_v15  ;;  %v3193_v12 = vld [vmem:[#allocation5 + $0x568] ss:$16 sps:$4 sm:$0xff]   ;;  %v3204_v15 = vld [vmem:[#allocation5 + $0x74c] ss:$16 sps:$4 sm:$0xff]  }
  0xf3   :  { %1839 = vmatprep.subr.bf16.mxu1 %v3112_v14  ;;  %v3201_v14 = vld [vmem:[#allocation5 + $0x54c] ss:$16 sps:$4 sm:$0xff]  }
  0xf5   :  { %1879 = vmatpush2.bf16.msra.mxu0 %v3113_v17  ;;  %v3202_v17 = vld [vmem:[#allocation5 + $0x748] ss:$16 sps:$4 sm:$0xff]  }
  0xf6   :  { %1840 = vmatpush2.bf16.msra.mxu1 %v3110_v16  ;;  %1880 = vmatprep.subr.bf16.mxu0 %v3121_v20  ;;  %v3199_v16 = vld [vmem:[#allocation5 + $0x548] ss:$16 sps:$4 sm:$0xff]   ;;  %v3210_v20 = vld [vmem:[#allocation5 + $0x72c] ss:$16 sps:$4 sm:$0xff]  }
  0xf7   :  { %1841 = vmatprep.subr.bf16.mxu1 %v3118_v19  ;;  %v3207_v19 = vld [vmem:[#allocation5 + $0x52c] ss:$16 sps:$4 sm:$0xff]  }
  0xf9   :  { %1881 = vmatpush2.bf16.msra.mxu0 %v3119_v22  ;;  %v3208_v22 = vld [vmem:[#allocation5 + $0x728] ss:$16 sps:$4 sm:$0xff]  }
  0xfa   :  { %1842 = vmatpush2.bf16.msra.mxu1 %v3116_v21  ;;  %1882 = vmatprep.subr.bf16.mxu0 %v3124_v24  ;;  %v3205_v21 = vld [vmem:[#allocation5 + $0x528] ss:$16 sps:$4 sm:$0xff]   ;;  %v3213_v24 = vld [vmem:[#allocation5 + $0x50c] ss:$16 sps:$4 sm:$0xff]  }
  0xfb   :  { %1893 = vmatprep.subr.bf16.mxu1 %v3127_v25  ;;  %v3216_v25 = vld [vmem:[#allocation5 + $0x70c] ss:$16 sps:$4 sm:$0xff]  }
  0xfd   :  { %1844 = vmatmul.mubr.bf16.vlgmr.msra.gmra.mxu1 %v3464_v8  ;;  %1883 = vmatpush2.bf16.msra.mxu0 %v3122_v26  ;;  %v3140_v8 = vld [vmem:[#allocation5 + $0x488] ss:$16 sps:$4 sm:$0xff]  }
  0xfe   :  { %1894 = vmatpush1.bf16.msra.mxu1 %v3125_v27  ;;  %1934 = vmatprep.subr.bf16.mxu0 %v3133_v29  ;;  %v3211_v26 = vld [vmem:[#allocation5 + $0x508] ss:$16 sps:$4 sm:$0xff]   ;;  %v3218_v29 = vld [vmem:[#allocation8 + $0x38] sm:$0xff]  }
  0xff   :  { %1895 = vmatprep.subr.bf16.mxu1 %v3130_v28  ;;  %1925 = vmatprep.mubr.bf16.mxu1 %v3474_v38  ;;  %v3149_v38 = vld [vmem:[#allocation5 + $0x688] ss:$16 sps:$4 sm:$0xff]   ;;  %v3217_v28 = vld [vmem:[#allocation8 + $0x78] sm:$0xff]  }
 0x100   :  { %1885 = vmatmul.mubr.bf16.vlgmr.msra.gmra.mxu0 %v3466_v9  ;;  %v3146_v9 = vld [vmem:[#allocation5 + $0x468] ss:$16 sps:$4 sm:$0xff]  }
 0x101   :  { %1935 = vmatpush1.bf16.msra.mxu0 %v3131_v31  ;;  %2713 = vmatprep.mubr.msk.bf16.mxu0 %vm1630_vm0, %v3470_v34  ;;  %v3155_v34 = vld [vmem:[#allocation5 + $0x668] ss:$16 sps:$4 sm:$0xff]  }
 0x102   :  { %1896 = vmatpush1.bf16.msra.mxu1 %v3128_v30  ;;  %1936 = vmatprep.subr.bf16.mxu0 %v3139_v33  ;;  %v3214_v27 = vld [vmem:[#allocation5 + $0x708] ss:$16 sps:$4 sm:$0xff]  }
 0x103   :  { %1897 = vmatprep.subr.bf16.mxu1 %v3136_v32  ;;  %v3219_v30 = vld [vmem:[#allocation8 + $0x70] sm:$0xff]   ;;  %v3221_v32 = vld [vmem:[#allocation8 + $0x68] sm:$0xff]  }
 0x104   :  { %v3220_v31 = vld [vmem:[#allocation8 + $0x30] sm:$0xff]  }
 0x105   :  { %1937 = vmatpush1.bf16.msra.mxu0 %v3137_v49  ;;  %v3222_v49 = vld [vmem:[#allocation8 + $0x28] sm:$0xff]  }
 0x106   :  { %1898 = vmatpush1.bf16.msra.mxu1 %v3134_v35  ;;  %1938 = vmatprep.subr.bf16.mxu0 %v3145_v37 }
 0x107   :  { %1899 = vmatprep.subr.bf16.mxu1 %v3142_v36 }
 0x109   :  { %1939 = vmatpush1.bf16.msra.mxu0 %v3143_v39 }
 0x10a   :  { %1900 = vmatpush1.bf16.msra.mxu1 %v3140_v8  ;;  %1940 = vmatprep.subr.bf16.mxu0 %v3151_v41  ;;  %v3223_v8 = vld [vmem:[#allocation8 + $0x60] sm:$0xff]   ;;  %v3225_v41 = vld [vmem:[#allocation8 + $0x58] sm:$0xff]  }
 0x10b   :  { %1901 = vmatprep.subr.bf16.mxu1 %v3148_v40 }
 0x10d   :  { %1941 = vmatpush1.bf16.msra.mxu0 %v3149_v38  ;;  %v3233_v38 = vld [vmem:[#allocation8 + $0xf8] sm:$0xff]  }
 0x10e   :  { %1902 = vmatpush1.bf16.msra.mxu1 %v3146_v9  ;;  %1942 = vmatprep.subr.bf16.mxu0 %v3157_v42  ;;  %v3235_v42 = vld [vmem:[#allocation8 + $0xf0] sm:$0xff]  }
 0x10f   :  { %1903 = vmatprep.subr.bf16.mxu1 %v3154_v52  ;;  %v3234_v52 = vld [vmem:[#allocation8 + $0xb8] sm:$0xff]  }
 0x111   :  { %1943 = vmatpush1.bf16.msra.mxu0 %v3155_v34  ;;  %v3236_v34 = vld [vmem:[#allocation8 + $0xb0] sm:$0xff]  }
 0x112   :  { %1904 = vmatpush1.bf16.msra.mxu1 %v3152_v43  ;;  %1944 = vmatprep.subr.bf16.mxu0 %v3163_v45  ;;  %v3226_v43 = vld [vmem:[#allocation8 + $0x18] sm:$0xff]   ;;  %v3237_v45 = vld [vmem:[#allocation8 + $0xe8] sm:$0xff]  }
 0x113   :  { %1905 = vmatprep.subr.bf16.mxu1 %v3160_v44  ;;  %v3227_v44 = vld [vmem:[#allocation8 + $0x50] sm:$0xff]  }
 0x115   :  { %1945 = vmatpush1.bf16.msra.mxu0 %v3161_v47  ;;  %v3238_v47 = vld [vmem:[#allocation8 + $0xa8] sm:$0xff]  }
 0x116   :  { %1906 = vmatpush1.bf16.msra.mxu1 %v3158_v46  ;;  %1946 = vmatprep.subr.bf16.mxu0 %v3169_v50  ;;  %v3228_v46 = vld [vmem:[#allocation8 + $0x10] sm:$0xff]   ;;  %v3239_v50 = vld [vmem:[#allocation8 + $0xe0] sm:$0xff]  }
 0x117   :  { %1907 = vmatprep.subr.bf16.mxu1 %v3166_v48  ;;  %v3229_v48 = vld [vmem:[#allocation8 + $0x48] sm:$0xff]  }
 0x119   :  { %1947 = vmatpush1.bf16.msra.mxu0 %v3167_v53  ;;  %v3240_v53 = vld [vmem:[#allocation8 + $0xa0] sm:$0xff]  }
 0x11a   :  { %1908 = vmatpush1.bf16.msra.mxu1 %v3164_v51  ;;  %1948 = vmatprep.subr.bf16.mxu0 %v3175_v55  ;;  %v3230_v51 = vld [vmem:[#allocation8 + $0x8] sm:$0xff]   ;;  %v3241_v55 = vld [vmem:[#allocation8 + $0xd8] sm:$0xff]  }
 0x11b   :  { %1909 = vmatprep.subr.bf16.mxu1 %v3172_v54  ;;  %v3231_v54 = vld [vmem:[#allocation8 + $0x40] sm:$0xff]  }
 0x11d   :  { %1949 = vmatpush1.bf16.msra.mxu0 %v3173_v58  ;;  %v360_v58 = vlaneseq }
 0x11e   :  { %1910 = vmatpush2.bf16.msra.mxu1 %v3170_v57  ;;  %2712 = vmatprep.subr.msk.bf16.mxu0 %vm1634_vm1, %v2709_v60  ;;  %v3242_v57 = vld [vmem:[#allocation8 + $0x98] sm:$0xff]  }
 0x11f   :  { %1911 = vmatprep.subr.bf16.mxu1 %v3178_v59  ;;  %v3500_v59 = vshrl.u32 %v360_v58, 7 }
 0x121   :  { %1953 = vmatpush2.bf16.msra.mxu0 %v1642_v63  ;;  %v362_v60 = vsub.s32 0, %v3500_v59 }
 0x122   :  { %1912 = vmatpush2.bf16.msra.mxu1 %v3176_v62  ;;  %1954 = vmatprep.subr.bf16.mxu0 %v3186_v1  ;;  %v366_v62 = vsub.s32 1, %v3500_v59  ;;  %v3243_v1 = vld [vmem:[#allocation8 + $0xd0] sm:$0xff]  }
 0x123   :  { %1913 = vmatprep.subr.bf16.mxu1 %v3183_v0  ;;  %v363_v63 = vrot.slane %v3503_v61, %v362_v60 }
 0x124   :  { %v367_v0 = vrot.slane %v3503_v61, %v366_v62 }
 0x125   :  { %1955 = vmatpush2.bf16.msra.mxu0 %v3184_v3  ;;  %v3244_v3 = vld [vmem:[#allocation8 + $0x90] sm:$0xff]  }
 0x126   :  { %1914 = vmatpush2.bf16.msra.mxu1 %v3181_v2  ;;  %1956 = vmatprep.subr.bf16.mxu0 %v3192_v5 }
 0x127   :  { %1915 = vmatprep.subr.bf16.mxu1 %v3189_v4 }
 0x129   :  { %1957 = vmatpush2.bf16.msra.mxu0 %v3190_v7  ;;  %v3245_v7 = vld [vmem:[#allocation8 + $0xc8] sm:$0xff]  }
 0x12a   :  { %1916 = vmatpush2.bf16.msra.mxu1 %v3187_v6  ;;  %1958 = vmatprep.subr.bf16.mxu0 %v3198_v11  ;;  %v3246_v11 = vld [vmem:[#allocation8 + $0x88] sm:$0xff]  }
 0x12b   :  { %1917 = vmatprep.subr.bf16.mxu1 %v3195_v10 }
 0x12d   :  { %1959 = vmatpush2.bf16.msra.mxu0 %v3196_v13 }
 0x12e   :  { %1918 = vmatpush2.bf16.msra.mxu1 %v3193_v12  ;;  %1960 = vmatprep.subr.bf16.mxu0 %v3204_v15 }
 0x12f   :  { %1919 = vmatprep.subr.bf16.mxu1 %v3201_v14 }
 0x131   :  { %1961 = vmatpush2.bf16.msra.mxu0 %v3202_v17 }
 0x132   :  { %1920 = vmatpush2.bf16.msra.mxu1 %v3199_v16  ;;  %1962 = vmatprep.subr.bf16.mxu0 %v3210_v20 }
 0x133   :  { %1921 = vmatprep.subr.bf16.mxu1 %v3207_v19  ;;  %v3247_v19 = vld [vmem:[#allocation8 + $0xc0] sm:$0xff]  }
 0x135   :  { %1963 = vmatpush2.bf16.msra.mxu0 %v3208_v22  ;;  %v3248_v22 = vld [vmem:[#allocation8 + $0x80] sm:$0xff]  }
 0x136   :  { %1922 = vmatpush2.bf16.msra.mxu1 %v3205_v21  ;;  %1964 = vmatprep.subr.bf16.mxu0 %v3216_v25 }
 0x137   :  { %1923 = vmatprep.subr.bf16.mxu1 %v3213_v24 }
 0x139   :  { %1965 = vmatpush2.bf16.msra.mxu0 %v3214_v27 }
 0x13a   :  { %1924 = vmatpush2.bf16.msra.mxu1 %v3211_v26  ;;  %2756 = vmatprep.subr.bf16.mxu0 %v3217_v28 }
 0x13b   :  { %2778 = vmatprep.subr.bf16.mxu1 %v3233_v38  ;;  %v370_v38 = vsub.s32 2, %v3500_v59 }
 0x13c   :  { %1967 = vmatmul.mubr.bf16.vlgmr.msra.gmra.mxu0 %v3479_v18 }
 0x13d   :  { %1926 = vmatmul.mubr.bf16.vlgmr.msra.gmra.mxu1 %v3482_v23  ;;  %2757 = vmatpush3.bf16.msra.mxu0 %v3218_v29  ;;  %v3224_v23 = vld [vmem:[#allocation8 + $0x20] sm:$0xff]  }
 0x13e   :  { %2758 = vmatprep.subr.bf16.mxu0 %v3219_v30  ;;  %2779 = vmatpush3.bf16.msra.mxu1 %v3234_v52  ;;  %v371_v52 = vrot.slane %v3503_v61, %v370_v38 }
 0x13f   :  { %2780 = vmatprep.subr.bf16.mxu1 %v3235_v42  ;;  %v374_v42 = vsub.s32 3, %v3500_v59 }
 0x140   :  { %v1681_v33 = vpop.f32.mrf.mxu0 }
 0x141   :  { %v3496_v35 = vpop.f32.mrf.mxu1  ;;  %2759 = vmatpush3.bf16.msra.mxu0 %v3220_v31  ;;  %v1682_v2 = vadd.f32 %v1681_v33, %v363_v63 }
 0x142   :  { %v1683_v36 = vpop.f32.mrf.mxu0  ;;  %2760 = vmatprep.subr.bf16.mxu0 %v3221_v32  ;;  %2781 = vmatpush3.bf16.msra.mxu1 %v3236_v34  ;;  %v375_v34 = vrot.slane %v3503_v61, %v374_v42  ;;  %v3254_v61 = vld [vmem:[#allocation10 + $0x10] sm:$0xff]  }
 0x143   :  { %v3498_v37 = vpop.f32.mrf.mxu1  ;;  %2782 = vmatprep.subr.bf16.mxu1 %v3237_v45  ;;  %v1684_v5 = vadd.f32 %v1683_v36, %v367_v0  ;;  %v1723_v10 = vadd.f32 %v3496_v35, %v1682_v2  ;;  %v3255_v2 = vld [vmem:[#allocation10 + $0x8] sm:$0xff]  }
 0x144   :  { %v1685_v39 = vpop.f32.mrf.mxu0 }
 0x145   :  { %v1726_v40 = vpop.f32.mrf.mxu1  ;;  %2761 = vmatpush3.bf16.msra.mxu0 %v3222_v49  ;;  %v1725_v14 = vadd.f32 %v3498_v37, %v1684_v5  ;;  %v3249_v39 = vld [vmem:[#allocation10 + $0x38] sm:$0xff]   ;;  %v3256_v5 = vld [vmem:[#allocation10] sm:$0xff]  }
 0x146   :  { %v1686_v18 = vpop.f32.mrf.mxu0  ;;  %2762 = vmatprep.subr.bf16.mxu0 %v3223_v8  ;;  %2783 = vmatpush3.bf16.msra.mxu1 %v3238_v47  ;;  %v3394_v40 = vmov 0.0  }
 0x147   :  { %v1727_v9 = vpop.f32.mrf.mxu1  ;;  %2784 = vmatprep.subr.bf16.mxu1 %v3239_v50  ;;  %v3252_v18 = vld [vmem:[#allocation10 + $0x20] sm:$0xff]  }
 0x148   :  { %v3253_v9 = vld [vmem:[#allocation10 + $0x18] sm:$0xff]  }
 0x149   :  { %2763 = vmatpush3.bf16.msra.mxu0 %v3224_v23  ;;  %v3250_v23 = vld [vmem:[#allocation10 + $0x30] sm:$0xff]  }
 0x14a   :  { %2764 = vmatprep.subr.bf16.mxu0 %v3225_v41  ;;  %2785 = vmatpush3.bf16.msra.mxu1 %v3240_v53  ;;  %v3251_v41 = vld [vmem:[#allocation10 + $0x28] sm:$0xff]  }
 0x14b   :  { %2786 = vmatprep.subr.bf16.mxu1 %v3241_v55 }
 0x14d   :  { %2765 = vmatpush3.bf16.msra.mxu0 %v3226_v43 }
 0x14e   :  { %2766 = vmatprep.subr.bf16.mxu0 %v3227_v44  ;;  %2787 = vmatpush3.bf16.msra.mxu1 %v3242_v57 }
 0x14f   :  { %2788 = vmatprep.subr.bf16.mxu1 %v3243_v1 }
 0x151   :  { %2767 = vmatpush3.bf16.msra.mxu0 %v3228_v46 }
 0x152   :  { %2768 = vmatprep.subr.bf16.mxu0 %v3229_v48  ;;  %2789 = vmatpush3.bf16.msra.mxu1 %v3244_v3 }
 0x153   :  { %2790 = vmatprep.subr.bf16.mxu1 %v3245_v7 }
 0x155   :  { %2769 = vmatpush3.bf16.msra.mxu0 %v3230_v51 }
 0x156   :  { %2770 = vmatprep.subr.bf16.mxu0 %v3231_v54  ;;  %2791 = vmatpush3.bf16.msra.mxu1 %v3246_v11  ;;  %v2714_v11 = vld [vmem:[%s3527_s4] ss:$0 sm:$0xff]  ;;  %s3357_s4 = scalar_lea.vmem %s2448_s30, 64 }
 0x157   :  { %2792 = vmatprep.subr.bf16.mxu1 %v3247_v19  ;;  %p3358_p11 = scmp.ne.s32.totalorder %s2448_s30, %s3357_s4  ;;  %p3363_p13 = scmp.lt.s32.totalorder %s3357_s4, %s3357_s4 }
 0x159   :  { %2771 = vmatpush3.bf16.msra.mxu0 %v3232_v56  ;;  %p3364_p0 = por %p3363_p13, %p3362_p12 }
 0x15a   :  { %2793 = vmatpush3.bf16.msra.mxu1 %v3248_v22  ;;  %2809 = vmatprep.subr.bf16.mxu0 %v3394_v40  ;;  %v2747_v22 = vld [vmem:[%s3529_s6] ss:$0 sm:$0xff] }
 0x15b   :  { %p3365_p1 = pnand %p3364_p0, %p3358_p11 }
 0x17d   :  { %v1804_v4 = vpop.f32.mrf.mxu1 }
 0x17f   :  { %v1806_v6 = vpop.f32.mrf.mxu1 }
 0x180   :  { %v1763_v12 = vpop.f32.mrf.mxu0 }
 0x181   :  { %v1808_v13 = vpop.f32.mrf.mxu1  ;;  %v1764_v15 = vadd.f32 %v1763_v12, %v1723_v10 }
 0x182   :  { %v1765_v16 = vpop.f32.mrf.mxu0 }
 0x183   :  { %v1809_v17 = vpop.f32.mrf.mxu1  ;;  %v1805_v20 = vadd.f32 %v1804_v4, %v1764_v15  ;;  %v1766_v21 = vadd.f32 %v1765_v16, %v1725_v14 }
 0x184   :  { %v1767_v24 = vpop.f32.mrf.mxu0 }
 0x185   :  { %v1807_v25 = vadd.f32 %v1806_v6, %v1766_v21  ;;  %v1975_v26 = vmax.f32 %v1805_v20, 0.0 }
 0x186   :  { %v1768_v27 = vpop.f32.mrf.mxu0 }
 0x187   :  { %v1976_v28 = vmax.f32 %v1807_v25, 0.0  ;;  %v1979_v30 = vpack.c.bf16 %v1975_v26, %v1975_v26 }
 0x189   :  { %v1980_v29 = vpack.c.bf16 %v1976_v28, %v1976_v28 }
 0x18b   :  { %2278 = vmatprep.mubr.bf16.mxu0 %v1980_v29 }
 0x18c   :  { %2279 = vmatmul.mubr.bf16.vlgmr.msra.gmra.mxu0 %v1979_v30 }
 0x18d   :  { %2810 = vmatpush3.bf16.msra.mxu0 %v3249_v39  ;;  %2825 = vmatprep.mubr.msk.bf16.mxu0 %vm3395_vm2, %v3394_v40 }
 0x18e   :  { %2811 = vmatprep.subr.bf16.mxu0 %v3394_v40 }
 0x191   :  { %2812 = vmatpush3.bf16.msra.mxu0 %v3250_v23 }
 0x192   :  { %2813 = vmatprep.subr.bf16.mxu0 %v3394_v40 }
 0x195   :  { %2814 = vmatpush3.bf16.msra.mxu0 %v3251_v41 }
 0x196   :  { %2815 = vmatprep.subr.bf16.mxu0 %v3394_v40 }
 0x199   :  { %2816 = vmatpush3.bf16.msra.mxu0 %v3252_v18 }
 0x19a   :  { %2817 = vmatprep.subr.bf16.mxu0 %v3394_v40 }
 0x19d   :  { %2818 = vmatpush3.bf16.msra.mxu0 %v3253_v9 }
 0x19e   :  { %2819 = vmatprep.subr.bf16.mxu0 %v3394_v40 }
 0x1a1   :  { %2820 = vmatpush3.bf16.msra.mxu0 %v3254_v61 }
 0x1a2   :  { %2821 = vmatprep.subr.bf16.mxu0 %v3394_v40 }
 0x1a5   :  { %2822 = vmatpush3.bf16.msra.mxu0 %v3255_v2 }
 0x1a6   :  { %2823 = vmatprep.subr.bf16.mxu0 %v3394_v40 }
 0x1a9   :  { %2824 = vmatpush3.bf16.msra.mxu0 %v3256_v5 }
 0x1bd   :  { %v1845_v31 = vpop.f32.mrf.mxu1 }
 0x1be   :  { %v1846_v43 = vadd.f32 %v1845_v31, %v371_v52 }
 0x1bf   :  { %v1847_v32 = vpop.f32.mrf.mxu1 }
 0x1c0   :  { %v1886_v35 = vpop.f32.mrf.mxu0  ;;  %v1848_v44 = vadd.f32 %v1847_v32, %v375_v34 }
 0x1c1   :  { %v1849_v33 = vpop.f32.mrf.mxu1  ;;  %v1887_v45 = vadd.f32 %v1886_v35, %v1846_v43 }
 0x1c2   :  { %v1888_v36 = vpop.f32.mrf.mxu0 }
 0x1c3   :  { %v1850_v49 = vpop.f32.mrf.mxu1  ;;  %v1889_v48 = vadd.f32 %v1888_v36, %v1848_v44 }
 0x1c4   :  { %v1890_v37 = vpop.f32.mrf.mxu0 }
 0x1c6   :  { %v1891_v8 = vpop.f32.mrf.mxu0 }
 0x1fc   :  { %v1968_v47 = vpop.f32.mrf.mxu0 }
 0x1fd   :  { %v1927_v46 = vpop.f32.mrf.mxu1 }
 0x1fe   :  { %v1928_v50 = vadd.f32 %v1927_v46, %v1887_v45  ;;  %v1970_v53 = vpop.f32.mrf.mxu0 }
 0x1ff   :  { %v1929_v51 = vpop.f32.mrf.mxu1 }
 0x200   :  { %v1969_v54 = vadd.f32 %v1968_v47, %v1928_v50  ;;  %v1930_v55 = vadd.f32 %v1929_v51, %v1889_v48  ;;  %v1972_v57 = vpop.f32.mrf.mxu0 }
 0x201   :  { %v1931_v56 = vpop.f32.mrf.mxu1 }
 0x202   :  { %v1971_v58 = vadd.f32 %v1970_v53, %v1930_v55  ;;  %v1977_v60 = vmax.f32 %v1969_v54, 0.0  ;;  %v1973_v63 = vpop.f32.mrf.mxu0 }
 0x203   :  { %v1932_v62 = vpop.f32.mrf.mxu1 }
 0x204   :  { %v1978_v59 = vmax.f32 %v1971_v58, 0.0  ;;  %v1981_v1 = vpack.c.bf16 %v1977_v60, %v1977_v60 }
 0x206   :  { %v1982_v0 = vpack.c.bf16 %v1978_v59, %v1978_v59 }
 0x208   :  { %2318 = vmatprep.mubr.bf16.mxu1 %v1982_v0 }
 0x209   :  { %2319 = vmatmul.mubr.bf16.vlgmr.msra.gmra.mxu1 %v1981_v1 }
 0x24c   :  { %v2772_v3 = vpop.f32.mrf.mxu0 }
 0x24e   :  { %v2773_v4 = vpop.f32.mrf.mxu0 }
 0x24f   :  { %v2774_v6 = vadd.f32 %v2773_v4, %v2772_v3 }
 0x250   :  { %v2775_v7 = vpop.f32.mrf.mxu0 }
 0x251   :  { %v2281_v14 = vadd.f32 %v2774_v6, %v2714_v11 }
 0x252   :  { %v2776_v10 = vpop.f32.mrf.mxu0 }
 0x2c9   :  { %v2794_v12 = vpop.f32.mrf.mxu1 }
 0x2cb   :  { %v2795_v13 = vpop.f32.mrf.mxu1 }
 0x2cc   :  { %v2796_v15 = vadd.f32 %v2795_v13, %v2794_v12 }
 0x2cd   :  { %v2797_v16 = vpop.f32.mrf.mxu1 }
 0x2ce   :  { %v2321_v17 = vadd.f32 %v2796_v15, %v2281_v14 }
 0x2cf   :  { %v2798_v19 = vpop.f32.mrf.mxu1 }
 0x2d0   :  { %v2326_v20 = vmax.f32 %v2321_v17, 0.0 }
 0x2d2   :  { %v2327_v21 = vpack.c.bf16 %v2326_v20, %v2326_v20 }
 0x2d4   :  { %2826 = vmatmul.mubr.bf16.vlgmr.msra.gmra.mxu0 %v2327_v21 }
 0x394   :  { %v2433_v24 = vpop.f32.mrf.mxu0 }
 0x395   :  { %v2434_v25 = vadd.f32 %v2747_v22, %v2433_v24 }
 0x396   :  { %v2827_v26 = vpop.f32.mrf.mxu0 }
 0x397   :  { %v2439_v27 = vpack.c.bf16 %v2434_v25, %v2434_v25 }
 0x398   :  { %v2436_v28 = vpop.f32.mrf.mxu0 }
 0x399   :  { %2440 = vst [vmem:[#allocation11] sm:$0xf] %v2439_v27 }
 0x39a   :  { %v2828_v29 = vpop.f32.mrf.mxu0 }
 0x39b   :  { %3368 = shalt.err (!%p3365_p1)
}
 0x39c   :  { %2450 = dma.vmem_to_hbm [thread:$0]  %s2448_s30, 64, %s3530_s7, [#allocation4]  }
 0x39d   :  { %3383 = dma.done.wait [#allocation4], 64  }
 0x39e   :  { %3384 = vsyncadd [#allocation4], 4294967232 }
 0x39f   :  { %2454 = vsyncpa [#allocation3], 1 }
 0x3a0   :  { %2455 = vsyncpa [#allocation6], 1 }
 0x3a1   :  { %2456 = vsyncpa [#allocation9], 1 }
 0x3a2   :  { %2457 = vsyncpa [#allocation4], 1 }

</bundles_post_ra>
